<compile_context>
chip_gen: v5e
topology: v5e:2x2
jax: 0.10.0
libtpu: 0.0.40
codegen_flags: <defaults>
</compile_context>

<pallas_src>
import functools

import jax
import jax.numpy as jnp
from jax.experimental import pallas as pl
from jax.experimental.pallas import tpu as pltpu

FS = 2048  # module-level `fs` (only used by the omitted plotting branch)


# ---------------------------------------------------------------------------
# Filter construction (port of DeepGaussianFilter.get_filters) -- setup glue
# ---------------------------------------------------------------------------
def gaussian_filters(sigma, filter_size, order):
    """Gaussian filter bank, shape [order+1, filter_size] (float32)."""
    xs = jnp.linspace(-3.0, 3.0, filter_size).astype(jnp.float32)
    s = jnp.asarray(sigma, jnp.float32).reshape(())
    g0 = jnp.exp(-(xs ** 2) / (2.0 * s ** 2.0))
    g0 = g0 / jnp.sum(g0)
    filters = [g0]
    if order >= 1:
        g1 = g0 * xs
        g1 = g1 / jnp.std(g1, ddof=1)            # torch.std default: unbiased
        filters.append(g1)
    if order >= 2:
        g2 = g0 * (xs ** 2 - s ** 2)
        g2 = g2 / jnp.std(g2, ddof=1)
        filters.append(g2)
    return jnp.stack(filters, axis=0)            # [NF, K]


# ---------------------------------------------------------------------------
# Pallas kernel: K shifted scalar*vector FMAs per register-resident sub-chunk
# ---------------------------------------------------------------------------
def _gauss_fir_kernel(taps_ref, xa_ref, xh_ref, o_ref, *, chunk):
    # taps_ref: SMEM [NF, K]      filter taps, read as scalars
    # xa_ref:   VMEM [B, TT]      padded-signal columns of this output tile
    # xh_ref:   VMEM [B, 128]     halo: only its first K-1 columns are used
    # o_ref:    VMEM [B, NF, TT]  output tile, torch layout
    nf, k = taps_ref.shape
    b, tt = xa_ref.shape
    nchunks = tt // chunk

    # Static (unrolled) loop over lane sub-chunks: accumulators + window stay in
    # vregs for each sub-chunk and are stored exactly once.
    for j in range(nchunks):
        cs = j * chunk
        if j < nchunks - 1:
            # Needed input lanes fully inside the current tile.
            xwin = xa_ref[:, cs:cs + chunk + (k - 1)]          # [B, chunk+K-1]
        else:
            # Last sub-chunk: only the K-1 tail columns come from the halo.
            xwin = jnp.concatenate(
                [xa_ref[:, cs:cs + chunk], xh_ref[:, 0:k - 1]], axis=-1)

        w = xwin[:, 0:chunk]                                   # tap 0
        accs = [taps_ref[f, 0] * w for f in range(nf)]
        for kk in range(1, k):                                 # K-1 shifted MACs
            w = xwin[:, kk:kk + chunk]                         # shared by all filters
            for f in range(nf):                                # VPU scalar*vector FMA
                accs[f] = accs[f] + taps_ref[f, kk] * w

        for f in range(nf):                                    # torch-layout store
            o_ref[:, f, cs:cs + chunk] = accs[f]


# ---------------------------------------------------------------------------
# Forward pass wrapper
# ---------------------------------------------------------------------------
def _round_up(n, m):
    return ((n + m - 1) // m) * m


def _pick_tiles(t, chunk=512, tt_max=4096):
    """Pick (time_tile, sub_chunk): large lane-dense tiles, >=2 grid steps when possible."""
    t128 = _round_up(t, 128)
    if t128 <= chunk:
        return t128, t128                      # single tile, single chunk
    half = _round_up((t128 + 1) // 2, chunk)   # keep >=2 steps for v7x's 2 TCs
    tt = max(chunk, min(tt_max, half))
    return tt, chunk                           # tt is a multiple of chunk


@functools.partial(jax.jit, static_argnames=("filter_size", "order"))
def deep_gaussian_filter(x, sigma, *, filter_size=11, order=2):
    """DeepGaussianFilter.forward: x [B, T] -> y [B, order+1, T]."""
    if order > 2 or order < 0:
        raise ValueError("The order of the filter must be in [0, 2].")
    if filter_size <= 1 or filter_size % 2 == 0:
        raise ValueError("The filter size must be odd and > 1.")
    if filter_size > 129:
        raise ValueError("filter_size-1 must fit inside the 128-lane halo block.")

    b, t = x.shape
    nf = order + 1
    k = filter_size
    c = k // 2

    taps = gaussian_filters(sigma, k, order)          # [NF, K]
    x = x.astype(jnp.float32)

    tt, chunk = _pick_tiles(t)
    ngrid = (t + tt - 1) // tt

    # Single edge-replication pad (module's `pad`) straight to the frame width
    # every grid step can fetch: ngrid*TT columns + one 128-lane halo block.
    # Replicated tail values only feed output columns >= T, which are masked
    # on writeback of the final (possibly partial) output block.
    width = ngrid * tt + 128
    xp = jnp.pad(x, ((0, 0), (c, width - t - c)), mode="edge")   # [B, width]

    tt_blocks = tt // 128
    kernel = functools.partial(_gauss_fir_kernel, chunk=chunk)

    out = pl.pallas_call(
        kernel,
        out_shape=jax.ShapeDtypeStruct((b, nf, t), jnp.float32),
        grid=(ngrid,),
        in_specs=[
            pl.BlockSpec(memory_space=pltpu.MemorySpace.SMEM),          # taps -> SMEM scalars
            pl.BlockSpec((b, tt), lambda i: (0, i)),                    # current time tile
            pl.BlockSpec((b, 128), lambda i: (0, (i + 1) * tt_blocks)), # 128-lane halo
        ],
        out_specs=pl.BlockSpec((b, nf, tt), lambda i: (0, 0, i)),       # torch layout
        compiler_params=pltpu.CompilerParams(
            dimension_semantics=("parallel",)),
        cost_estimate=pl.CostEstimate(
            flops=2 * k * nf * b * t,
            transcendentals=0,
            bytes_accessed=(1 + nf) * b * t * 4),
    )(taps, xp, xp)

    return out                                        # [B, order+1, T], no transpose/slice


# ---------------------------------------------------------------------------
# Plain-JAX reference (for correctness check only)
# ---------------------------------------------------------------------------
def _reference_forward(x, sigma, filter_size, order):
    taps = gaussian_filters(sigma, filter_size, order)          # [NF, K]
    c = filter_size // 2
    t = x.shape[1]
    xpad = jnp.pad(x.astype(jnp.float32), ((0, 0), (c, c)), mode="edge")
    wins = jnp.stack([xpad[:, kk:kk + t] for kk in range(filter_size)], axis=-1)
    return jnp.einsum("btk,fk->bft", wins, taps)                # cross-correlation


if __name__ == "__main__":
    B, T = 4, 1024
    FILTER_SIZE, SIGMA, ORDER = 11, 1.0, 2

    key = jax.random.PRNGKey(0)
    x = jax.random.normal(key, (B, T), dtype=jnp.float32)
    sigma = jnp.array([SIGMA], dtype=jnp.float32)   # nn.Parameter(torch.tensor([sigma]))

    y = jax.block_until_ready(
        deep_gaussian_filter(x, sigma, filter_size=FILTER_SIZE, order=ORDER))

    assert y.shape == (B, ORDER + 1, T), y.shape
    assert bool(jnp.all(jnp.isfinite(y)))

    y_ref = _reference_forward(x, sigma, FILTER_SIZE, ORDER)
    assert bool(jnp.allclose(y, y_ref, atol=1e-4, rtol=1e-4)), "mismatch vs reference"

    print("KERNEL_OK")
</pallas_src>

<mosaic_0001>
module attributes {stable_mosaic.version = 11 : i64} {
  func.func @_gauss_fir_kernel(%arg0: i32, %arg1: memref<3x11xf32, #tpu.memory_space<smem>>, %arg2: memref<4x512xf32, #tpu.memory_space<vmem>>, %arg3: memref<4x128xf32, #tpu.memory_space<vmem>>, %arg4: memref<4x3x512xf32, #tpu.memory_space<vmem>>) attributes {dimension_semantics = [#tpu.dimension_semantics<parallel>], iteration_bounds = array<i64: 2>, scalar_prefetch = 0 : i64, scratch_operands = 0 : i64, tpu.core_type = #tpu.core_type<tc>, window_params = [{transform_indices = @transform_0, window_bounds = array<i64: 3, 11>}, {transform_indices = @transform_1, window_bounds = array<i64: 4, 512>}, {transform_indices = @transform_2, window_bounds = array<i64: 4, 128>}, {transform_indices = @transform_3, window_bounds = array<i64: 4, 3, 512>}]} {
    %c0 = arith.constant 0 : index
    %c0_0 = arith.constant 0 : index
    %0 = vector.load %arg2[%c0, %c0_0] : memref<4x512xf32, #tpu.memory_space<vmem>>, vector<4x512xf32>
    %c0_1 = arith.constant 0 : index
    %c0_2 = arith.constant 0 : index
    %1 = vector.load %arg3[%c0_1, %c0_2] : memref<4x128xf32, #tpu.memory_space<vmem>>, vector<4x10xf32>
    %2 = tpu.concatenate %0, %1 in 1 : vector<4x512xf32>, vector<4x10xf32> -> vector<4x522xf32>
    %3 = vector.extract_strided_slice %2 {offsets = [0, 0], sizes = [4, 512], strides = [1, 1]} : vector<4x522xf32> to vector<4x512xf32>
    %c0_3 = arith.constant 0 : index
    %c0_4 = arith.constant 0 : index
    %4 = memref.load %arg1[%c0_3, %c0_4] : memref<3x11xf32, #tpu.memory_space<smem>>
    %5 = vector.broadcast %4 : f32 to vector<4x512xf32>
    %6 = arith.mulf %5, %3 : vector<4x512xf32>
    %c1 = arith.constant 1 : index
    %c0_5 = arith.constant 0 : index
    %7 = memref.load %arg1[%c1, %c0_5] : memref<3x11xf32, #tpu.memory_space<smem>>
    %8 = vector.broadcast %7 : f32 to vector<4x512xf32>
    %9 = arith.mulf %8, %3 : vector<4x512xf32>
    %c2 = arith.constant 2 : index
    %c0_6 = arith.constant 0 : index
    %10 = memref.load %arg1[%c2, %c0_6] : memref<3x11xf32, #tpu.memory_space<smem>>
    %11 = vector.broadcast %10 : f32 to vector<4x512xf32>
    %12 = arith.mulf %11, %3 : vector<4x512xf32>
    %13 = vector.extract_strided_slice %2 {offsets = [0, 1], sizes = [4, 512], strides = [1, 1]} : vector<4x522xf32> to vector<4x512xf32>
    %c0_7 = arith.constant 0 : index
    %c1_8 = arith.constant 1 : index
    %14 = memref.load %arg1[%c0_7, %c1_8] : memref<3x11xf32, #tpu.memory_space<smem>>
    %15 = vector.broadcast %14 : f32 to vector<4x512xf32>
    %16 = arith.mulf %15, %13 : vector<4x512xf32>
    %17 = arith.addf %6, %16 : vector<4x512xf32>
    %c1_9 = arith.constant 1 : index
    %c1_10 = arith.constant 1 : index
    %18 = memref.load %arg1[%c1_9, %c1_10] : memref<3x11xf32, #tpu.memory_space<smem>>
    %19 = vector.broadcast %18 : f32 to vector<4x512xf32>
    %20 = arith.mulf %19, %13 : vector<4x512xf32>
    %21 = arith.addf %9, %20 : vector<4x512xf32>
    %c2_11 = arith.constant 2 : index
    %c1_12 = arith.constant 1 : index
    %22 = memref.load %arg1[%c2_11, %c1_12] : memref<3x11xf32, #tpu.memory_space<smem>>
    %23 = vector.broadcast %22 : f32 to vector<4x512xf32>
    %24 = arith.mulf %23, %13 : vector<4x512xf32>
    %25 = arith.addf %12, %24 : vector<4x512xf32>
    %26 = vector.extract_strided_slice %2 {offsets = [0, 2], sizes = [4, 512], strides = [1, 1]} : vector<4x522xf32> to vector<4x512xf32>
    %c0_13 = arith.constant 0 : index
    %c2_14 = arith.constant 2 : index
    %27 = memref.load %arg1[%c0_13, %c2_14] : memref<3x11xf32, #tpu.memory_space<smem>>
    %28 = vector.broadcast %27 : f32 to vector<4x512xf32>
    %29 = arith.mulf %28, %26 : vector<4x512xf32>
    %30 = arith.addf %17, %29 : vector<4x512xf32>
    %c1_15 = arith.constant 1 : index
    %c2_16 = arith.constant 2 : index
    %31 = memref.load %arg1[%c1_15, %c2_16] : memref<3x11xf32, #tpu.memory_space<smem>>
    %32 = vector.broadcast %31 : f32 to vector<4x512xf32>
    %33 = arith.mulf %32, %26 : vector<4x512xf32>
    %34 = arith.addf %21, %33 : vector<4x512xf32>
    %c2_17 = arith.constant 2 : index
    %c2_18 = arith.constant 2 : index
    %35 = memref.load %arg1[%c2_17, %c2_18] : memref<3x11xf32, #tpu.memory_space<smem>>
    %36 = vector.broadcast %35 : f32 to vector<4x512xf32>
    %37 = arith.mulf %36, %26 : vector<4x512xf32>
    %38 = arith.addf %25, %37 : vector<4x512xf32>
    %39 = vector.extract_strided_slice %2 {offsets = [0, 3], sizes = [4, 512], strides = [1, 1]} : vector<4x522xf32> to vector<4x512xf32>
    %c0_19 = arith.constant 0 : index
    %c3 = arith.constant 3 : index
    %40 = memref.load %arg1[%c0_19, %c3] : memref<3x11xf32, #tpu.memory_space<smem>>
    %41 = vector.broadcast %40 : f32 to vector<4x512xf32>
    %42 = arith.mulf %41, %39 : vector<4x512xf32>
    %43 = arith.addf %30, %42 : vector<4x512xf32>
    %c1_20 = arith.constant 1 : index
    %c3_21 = arith.constant 3 : index
    %44 = memref.load %arg1[%c1_20, %c3_21] : memref<3x11xf32, #tpu.memory_space<smem>>
    %45 = vector.broadcast %44 : f32 to vector<4x512xf32>
    %46 = arith.mulf %45, %39 : vector<4x512xf32>
    %47 = arith.addf %34, %46 : vector<4x512xf32>
    %c2_22 = arith.constant 2 : index
    %c3_23 = arith.constant 3 : index
    %48 = memref.load %arg1[%c2_22, %c3_23] : memref<3x11xf32, #tpu.memory_space<smem>>
    %49 = vector.broadcast %48 : f32 to vector<4x512xf32>
    %50 = arith.mulf %49, %39 : vector<4x512xf32>
    %51 = arith.addf %38, %50 : vector<4x512xf32>
    %52 = vector.extract_strided_slice %2 {offsets = [0, 4], sizes = [4, 512], strides = [1, 1]} : vector<4x522xf32> to vector<4x512xf32>
    %c0_24 = arith.constant 0 : index
    %c4 = arith.constant 4 : index
    %53 = memref.load %arg1[%c0_24, %c4] : memref<3x11xf32, #tpu.memory_space<smem>>
    %54 = vector.broadcast %53 : f32 to vector<4x512xf32>
    %55 = arith.mulf %54, %52 : vector<4x512xf32>
    %56 = arith.addf %43, %55 : vector<4x512xf32>
    %c1_25 = arith.constant 1 : index
    %c4_26 = arith.constant 4 : index
    %57 = memref.load %arg1[%c1_25, %c4_26] : memref<3x11xf32, #tpu.memory_space<smem>>
    %58 = vector.broadcast %57 : f32 to vector<4x512xf32>
    %59 = arith.mulf %58, %52 : vector<4x512xf32>
    %60 = arith.addf %47, %59 : vector<4x512xf32>
    %c2_27 = arith.constant 2 : index
    %c4_28 = arith.constant 4 : index
    %61 = memref.load %arg1[%c2_27, %c4_28] : memref<3x11xf32, #tpu.memory_space<smem>>
    %62 = vector.broadcast %61 : f32 to vector<4x512xf32>
    %63 = arith.mulf %62, %52 : vector<4x512xf32>
    %64 = arith.addf %51, %63 : vector<4x512xf32>
    %65 = vector.extract_strided_slice %2 {offsets = [0, 5], sizes = [4, 512], strides = [1, 1]} : vector<4x522xf32> to vector<4x512xf32>
    %c0_29 = arith.constant 0 : index
    %c5 = arith.constant 5 : index
    %66 = memref.load %arg1[%c0_29, %c5] : memref<3x11xf32, #tpu.memory_space<smem>>
    %67 = vector.broadcast %66 : f32 to vector<4x512xf32>
    %68 = arith.mulf %67, %65 : vector<4x512xf32>
    %69 = arith.addf %56, %68 : vector<4x512xf32>
    %c1_30 = arith.constant 1 : index
    %c5_31 = arith.constant 5 : index
    %70 = memref.load %arg1[%c1_30, %c5_31] : memref<3x11xf32, #tpu.memory_space<smem>>
    %71 = vector.broadcast %70 : f32 to vector<4x512xf32>
    %72 = arith.mulf %71, %65 : vector<4x512xf32>
    %73 = arith.addf %60, %72 : vector<4x512xf32>
    %c2_32 = arith.constant 2 : index
    %c5_33 = arith.constant 5 : index
    %74 = memref.load %arg1[%c2_32, %c5_33] : memref<3x11xf32, #tpu.memory_space<smem>>
    %75 = vector.broadcast %74 : f32 to vector<4x512xf32>
    %76 = arith.mulf %75, %65 : vector<4x512xf32>
    %77 = arith.addf %64, %76 : vector<4x512xf32>
    %78 = vector.extract_strided_slice %2 {offsets = [0, 6], sizes = [4, 512], strides = [1, 1]} : vector<4x522xf32> to vector<4x512xf32>
    %c0_34 = arith.constant 0 : index
    %c6 = arith.constant 6 : index
    %79 = memref.load %arg1[%c0_34, %c6] : memref<3x11xf32, #tpu.memory_space<smem>>
    %80 = vector.broadcast %79 : f32 to vector<4x512xf32>
    %81 = arith.mulf %80, %78 : vector<4x512xf32>
    %82 = arith.addf %69, %81 : vector<4x512xf32>
    %c1_35 = arith.constant 1 : index
    %c6_36 = arith.constant 6 : index
    %83 = memref.load %arg1[%c1_35, %c6_36] : memref<3x11xf32, #tpu.memory_space<smem>>
    %84 = vector.broadcast %83 : f32 to vector<4x512xf32>
    %85 = arith.mulf %84, %78 : vector<4x512xf32>
    %86 = arith.addf %73, %85 : vector<4x512xf32>
    %c2_37 = arith.constant 2 : index
    %c6_38 = arith.constant 6 : index
    %87 = memref.load %arg1[%c2_37, %c6_38] : memref<3x11xf32, #tpu.memory_space<smem>>
    %88 = vector.broadcast %87 : f32 to vector<4x512xf32>
    %89 = arith.mulf %88, %78 : vector<4x512xf32>
    %90 = arith.addf %77, %89 : vector<4x512xf32>
    %91 = vector.extract_strided_slice %2 {offsets = [0, 7], sizes = [4, 512], strides = [1, 1]} : vector<4x522xf32> to vector<4x512xf32>
    %c0_39 = arith.constant 0 : index
    %c7 = arith.constant 7 : index
    %92 = memref.load %arg1[%c0_39, %c7] : memref<3x11xf32, #tpu.memory_space<smem>>
    %93 = vector.broadcast %92 : f32 to vector<4x512xf32>
    %94 = arith.mulf %93, %91 : vector<4x512xf32>
    %95 = arith.addf %82, %94 : vector<4x512xf32>
    %c1_40 = arith.constant 1 : index
    %c7_41 = arith.constant 7 : index
    %96 = memref.load %arg1[%c1_40, %c7_41] : memref<3x11xf32, #tpu.memory_space<smem>>
    %97 = vector.broadcast %96 : f32 to vector<4x512xf32>
    %98 = arith.mulf %97, %91 : vector<4x512xf32>
    %99 = arith.addf %86, %98 : vector<4x512xf32>
    %c2_42 = arith.constant 2 : index
    %c7_43 = arith.constant 7 : index
    %100 = memref.load %arg1[%c2_42, %c7_43] : memref<3x11xf32, #tpu.memory_space<smem>>
    %101 = vector.broadcast %100 : f32 to vector<4x512xf32>
    %102 = arith.mulf %101, %91 : vector<4x512xf32>
    %103 = arith.addf %90, %102 : vector<4x512xf32>
    %104 = vector.extract_strided_slice %2 {offsets = [0, 8], sizes = [4, 512], strides = [1, 1]} : vector<4x522xf32> to vector<4x512xf32>
    %c0_44 = arith.constant 0 : index
    %c8 = arith.constant 8 : index
    %105 = memref.load %arg1[%c0_44, %c8] : memref<3x11xf32, #tpu.memory_space<smem>>
    %106 = vector.broadcast %105 : f32 to vector<4x512xf32>
    %107 = arith.mulf %106, %104 : vector<4x512xf32>
    %108 = arith.addf %95, %107 : vector<4x512xf32>
    %c1_45 = arith.constant 1 : index
    %c8_46 = arith.constant 8 : index
    %109 = memref.load %arg1[%c1_45, %c8_46] : memref<3x11xf32, #tpu.memory_space<smem>>
    %110 = vector.broadcast %109 : f32 to vector<4x512xf32>
    %111 = arith.mulf %110, %104 : vector<4x512xf32>
    %112 = arith.addf %99, %111 : vector<4x512xf32>
    %c2_47 = arith.constant 2 : index
    %c8_48 = arith.constant 8 : index
    %113 = memref.load %arg1[%c2_47, %c8_48] : memref<3x11xf32, #tpu.memory_space<smem>>
    %114 = vector.broadcast %113 : f32 to vector<4x512xf32>
    %115 = arith.mulf %114, %104 : vector<4x512xf32>
    %116 = arith.addf %103, %115 : vector<4x512xf32>
    %117 = vector.extract_strided_slice %2 {offsets = [0, 9], sizes = [4, 512], strides = [1, 1]} : vector<4x522xf32> to vector<4x512xf32>
    %c0_49 = arith.constant 0 : index
    %c9 = arith.constant 9 : index
    %118 = memref.load %arg1[%c0_49, %c9] : memref<3x11xf32, #tpu.memory_space<smem>>
    %119 = vector.broadcast %118 : f32 to vector<4x512xf32>
    %120 = arith.mulf %119, %117 : vector<4x512xf32>
    %121 = arith.addf %108, %120 : vector<4x512xf32>
    %c1_50 = arith.constant 1 : index
    %c9_51 = arith.constant 9 : index
    %122 = memref.load %arg1[%c1_50, %c9_51] : memref<3x11xf32, #tpu.memory_space<smem>>
    %123 = vector.broadcast %122 : f32 to vector<4x512xf32>
    %124 = arith.mulf %123, %117 : vector<4x512xf32>
    %125 = arith.addf %112, %124 : vector<4x512xf32>
    %c2_52 = arith.constant 2 : index
    %c9_53 = arith.constant 9 : index
    %126 = memref.load %arg1[%c2_52, %c9_53] : memref<3x11xf32, #tpu.memory_space<smem>>
    %127 = vector.broadcast %126 : f32 to vector<4x512xf32>
    %128 = arith.mulf %127, %117 : vector<4x512xf32>
    %129 = arith.addf %116, %128 : vector<4x512xf32>
    %130 = vector.extract_strided_slice %2 {offsets = [0, 10], sizes = [4, 512], strides = [1, 1]} : vector<4x522xf32> to vector<4x512xf32>
    %c0_54 = arith.constant 0 : index
    %c10 = arith.constant 10 : index
    %131 = memref.load %arg1[%c0_54, %c10] : memref<3x11xf32, #tpu.memory_space<smem>>
    %132 = vector.broadcast %131 : f32 to vector<4x512xf32>
    %133 = arith.mulf %132, %130 : vector<4x512xf32>
    %134 = arith.addf %121, %133 : vector<4x512xf32>
    %c1_55 = arith.constant 1 : index
    %c10_56 = arith.constant 10 : index
    %135 = memref.load %arg1[%c1_55, %c10_56] : memref<3x11xf32, #tpu.memory_space<smem>>
    %136 = vector.broadcast %135 : f32 to vector<4x512xf32>
    %137 = arith.mulf %136, %130 : vector<4x512xf32>
    %138 = arith.addf %125, %137 : vector<4x512xf32>
    %c2_57 = arith.constant 2 : index
    %c10_58 = arith.constant 10 : index
    %139 = memref.load %arg1[%c2_57, %c10_58] : memref<3x11xf32, #tpu.memory_space<smem>>
    %140 = vector.broadcast %139 : f32 to vector<4x512xf32>
    %141 = arith.mulf %140, %130 : vector<4x512xf32>
    %142 = arith.addf %129, %141 : vector<4x512xf32>
    %c0_59 = arith.constant 0 : index
    %c0_60 = arith.constant 0 : index
    %c0_61 = arith.constant 0 : index
    %143 = vector.load %arg4[%c0_59, %c0_60, %c0_61] : memref<4x3x512xf32, #tpu.memory_space<vmem>>, vector<4x1x512xf32>
    %144 = vector.shape_cast %143 : vector<4x1x512xf32> to vector<4x512xf32>
    %145 = vector.shape_cast %134 : vector<4x512xf32> to vector<4x1x512xf32>
    tpu.vector_store %arg4[%c0_59, %c0_60, %c0_61], %145 {strides = array<i32>} : memref<4x3x512xf32, #tpu.memory_space<vmem>>, vector<4x1x512xf32>,
    %c0_62 = arith.constant 0 : index
    %c1_63 = arith.constant 1 : index
    %c0_64 = arith.constant 0 : index
    %146 = vector.load %arg4[%c0_62, %c1_63, %c0_64] : memref<4x3x512xf32, #tpu.memory_space<vmem>>, vector<4x1x512xf32>
    %147 = vector.shape_cast %146 : vector<4x1x512xf32> to vector<4x512xf32>
    %148 = vector.shape_cast %138 : vector<4x512xf32> to vector<4x1x512xf32>
    tpu.vector_store %arg4[%c0_62, %c1_63, %c0_64], %148 {strides = array<i32>} : memref<4x3x512xf32, #tpu.memory_space<vmem>>, vector<4x1x512xf32>,
    %c0_65 = arith.constant 0 : index
    %c2_66 = arith.constant 2 : index
    %c0_67 = arith.constant 0 : index
    %149 = vector.load %arg4[%c0_65, %c2_66, %c0_67] : memref<4x3x512xf32, #tpu.memory_space<vmem>>, vector<4x1x512xf32>
    %150 = vector.shape_cast %149 : vector<4x1x512xf32> to vector<4x512xf32>
    %151 = vector.shape_cast %142 : vector<4x512xf32> to vector<4x1x512xf32>
    tpu.vector_store %arg4[%c0_65, %c2_66, %c0_67], %151 {strides = array<i32>} : memref<4x3x512xf32, #tpu.memory_space<vmem>>, vector<4x1x512xf32>,
    return
  }
  func.func @transform_0(%arg0: i32) -> (i32, i32) {
    %c0_i32 = arith.constant 0 : i32
    %c0_i32_0 = arith.constant 0 : i32
    %c0_i32_1 = arith.constant 0 : i32
    return %c0_i32, %c0_i32_0 : i32, i32
  }
  func.func @transform_1(%arg0: i32) -> (i32, i32) {
    %c0_i32 = arith.constant 0 : i32
    %c0_i32_0 = arith.constant 0 : i32
    return %c0_i32, %arg0 : i32, i32
  }
  func.func @transform_2(%arg0: i32) -> (i32, i32) {
    %c1_i32 = arith.constant 1 : i32
    %0 = arith.addi %arg0, %c1_i32 : i32
    %c4_i32 = arith.constant 4 : i32
    %1 = arith.muli %0, %c4_i32 : i32
    %c0_i32 = arith.constant 0 : i32
    %c0_i32_0 = arith.constant 0 : i32
    return %c0_i32, %1 : i32, i32
  }
  func.func @transform_3(%arg0: i32) -> (i32, i32, i32) {
    %c0_i32 = arith.constant 0 : i32
    %c0_i32_0 = arith.constant 0 : i32
    %c0_i32_1 = arith.constant 0 : i32
    return %c0_i32, %c0_i32_0, %arg0 : i32, i32, i32
  }
}

</mosaic_0001>

<bundles_post_ra>
// kernel: deep_gaussian_filter.1
= control target key start
LH: loop header
LB: loop body
LE: loop exit
PB: predicated region body
PF: predicated region fallthrough
CT: control target
= control target key end

     0   :  { %8 = vsyncpa [#allocation3], 0  ;;  %s1720_s12 = smov 0   ;;  %s1722_s13 = smov 0   ;;  %s2733_s0 = inlined_call_operand.vmem [shape: f32[3,11], index: 0, kind: input, shape index: {}]   ;;  %s2734_s1 = inlined_call_operand.vmem [shape: f32[4,1152], index: 1, kind: input, shape index: {}, may-alias: {1,2}]   ;;  %s2735_s2 = inlined_call_operand.vmem [shape: f32[4,1152], index: 2, kind: input, shape index: {}, may-alias: {1,2}]   ;;  %s2736_s3 = inlined_call_operand.vmem [shape: f32[4,3,1024], index: 3, kind: output, shape index: {}]  }
   0x1   :  { %s1724_s14 = smov 0  }
   0x2 LB: > { %s1733_s15 = sadd.s32 4294967295, %s1687_s14   ;;  %s1735_s16 = sadd.s32 1, %s1687_s14   ;;  %s1687_s14 = sphi %s1724_s14, %s2742_s14   ;;  %s1683_s13 = sphi %s1722_s13, %s2741_s13   ;;  %s1679_s12 = sphi %s1720_s12, %s2740_s12  }
   0x3   : > { %s95_s17 = ssub.s32 %s1687_s14, %s1735_s16  ;;  %s98_s18 = sadd.s32 1, %s1683_s13 }
   0x4   : > { %p96_p0 = scmp.eq.s32.totalorder %s95_s17, 0  ;;  %p108_p1 = scmp.ne.s32.totalorder %s1683_s13, %s1679_s12 }
   0x5   : > { %p109_p2 = scmp.eq.s32.totalorder %s1733_s15, 1  ;;  %p1531_p3 = scmp.ge.s32.totalorder %s1687_s14, 1 }
   0x6   : > { %s1743_s19 = scalar_select %p96_p0, %s1683_s13, %s98_s18  }
   0x7   : > { %p1745_p4 = por %p109_p2, %p108_p1  ;;  %p122_p5 = scmp.lt.s32.totalorder %s1687_s14, 3 }
   0x8   : > { %p1604_p6 = scmp.eq.s32.totalorder %s1733_s15, 0  ;;  %s134_s23 = sshll.u32 %s2733_s0, 4  ;;  %s135_s23 = int_to_ptr.vmem [resolvable:$true] %s134_s23 }
   0x9   : > { %p123_p7 = pnand %p1531_p3, %p122_p5  ;;  %s1689_s24 = smov [#allocation2]  }
   0xb   : > { %p1600_p8 = pneg %p123_p7  ;;  %175 = sbr.rel (%p123_p7) target bundleno = 568 (0x238), region = 32 }
   0xd   : > { %p1601_p9 = pnand %p1604_p6, %p1600_p8 }
   0xf   : > { %1603 = dma.vmem_to_smem (!%p1601_p9), %s135_s23, 64, %s1689_s24, [#allocation3]  }
  0x10   : > { %1674 = dma.done.wait (%p1604_p6), [#allocation3], 64  }
  0x11   : > { %1676 = vsyncadd (%p1604_p6), [#allocation3], 4294967232 }
  0x12   : > { %182 = sfence }
  0x13   : > { %s1537_s25 = sshll.u32 %s1733_s15, 2  ;;  %s1543_s26 = sld [smem:[#allocation2 + $0x1]]  ;;  %vm289_vm0 = vcmask 1039360   ;;  %vm392_vm1 = vcmask 1031168   ;;  %vm495_vm2 = vcmask 1022976   ;;  %vm598_vm3 = vcmask 1014784  }
  0x14   : > { %s1594_s27 = sadd.s32 4, %s1537_s25  ;;  %p215_p11 = scmp.lt.s32.totalorder %s1537_s25, 8  ;;  %vm701_vm4 = vcmask 1006592   ;;  %vm804_vm5 = vcmask 998400   ;;  %vm907_vm6 = vcmask 990208   ;;  %vm1010_vm7 = vcmask 982016  }
  0x15   : > { %p226_p10 = scmp.lt.s32.totalorder %s1594_s27, 8  ;;  %s1544_s29 = sld [smem:[#allocation2 + $0x81]]  ;;  %vm1113_vm8 = vcmask 973824   ;;  %vm1216_vm9 = vcmask 965632   ;;  %vm1306_vm10 = vcmask 1042434   ;;  %vm1312_vm11 = vcmask 1043459  }
  0x16   : > { %s2746_s25 = smov (!%p215_p11, %s1537_s25), 8  ;;  %s1690_s10 = smov 127   ;;  %vm1318_vm12 = vcmask 1044484   ;;  %vm1324_vm13 = vcmask 1045509   ;;  %vm1304_vm14 = vcmask 1040384   ;;  %vm1308_vm15 = vcmask 1041408  }
  0x17   : > { %s2744_s27 = smov (!%p226_p10, %s1594_s27), 8  ;;  %s1538_s6 = sshll.u32 %s2746_s25, 2 }
  0x18   : > { %s1540_s28 = sshll.u32 %s2744_s27, 2  ;;  %s218_s9 = scalar_lea.vmem %s2734_s1, %s1538_s6 }
  0x19   : > { %v268_v0 = vstv %s1543_s26  ;;  %s1757_s5 = scalar_lea.vmem %s2735_s2, %s1540_s28  ;;  %v233_v3 = vld [vmem:[%s218_s9] sm:$0xff]  ;;  %v234_v4 = vld [vmem:[%s218_s9 + $0x8] sm:$0xff]  ;;  %s1545_s11 = sld [smem:[#allocation2 + $0x101]] }
  0x1a   : > { %v1760_v1 = vld [vmem:[%s1757_s5] sm:$0xf]  ;;  %238 = vst [vmem:[#allocation1] ss:$2 sm:$0xff] %v233_v3  ;;  %s1546_s14 = sld [smem:[#allocation2 + $0x2]]  ;;  %s1691_s18 = smov 126  }
  0x1b   : > { %v273_v2 = vmul.f32 %v268_v0, %v1760_v1  ;;  %240 = vst [vmem:[#allocation1 + $0x10] ss:$2 sm:$0xff] %v234_v4  ;;  %v303_v5 = vstv %s1544_s29  ;;  %s1547_s17 = sld [smem:[#allocation2 + $0x82]]  ;;  %s1692_s24 = smov 125  }
  0x1c   : > { %v308_v20 = vmul.f32 %v303_v5, %v1760_v1  ;;  %s1548_s21 = sld [smem:[#allocation2 + $0x102]]  ;;  %s1693_s28 = smov 124  }
  0x1d   : > { %287 = vrot.lane.b32.xlu2 %v273_v2, %s1690_s10  ;;  %s1549_s22 = sld [smem:[#allocation2 + $0x3]]  ;;  %s1694_s7 = smov 123  }
  0x1e   : > { %s1550_s23 = sld [smem:[#allocation2 + $0x83]] }
  0x1f   : > { %v337_v16 = vstv %s1545_s11  ;;  %s1551_s25 = sld [smem:[#allocation2 + $0x103]] }
  0x20   : > { %v342_v21 = vmul.f32 %v337_v16, %v1760_v1  ;;  %v371_v23 = vstv %s1546_s14  ;;  %s1552_s26 = sld [smem:[#allocation2 + $0x4]] }
  0x21   : > { %v1767_v6 = vld.sshfl [vmem:[#allocation1] sm:$0xff pattern:$0x75316420]  ;;  %v1776_v11 = vld.sshfl [vmem:[#allocation1 + $0x8] sm:$0xff pattern:$0x75316420]  ;;  %v406_v27 = vstv %s1547_s17  ;;  %v376_v33 = vmul.f32 %v371_v23, %v1760_v1 }
  0x22   : > { %v1769_v7 = vld.sshfl [vmem:[#allocation1 + $0x10] sm:$0xff pattern:$0x75316420]  ;;  %v269_v8 = vmul.f32 %v268_v0, %v1767_v6  ;;  %v304_v9 = vmul.f32 %v303_v5, %v1767_v6  ;;  %v1778_v12 = vld.sshfl [vmem:[#allocation1 + $0x18] sm:$0xff pattern:$0x75316420]  ;;  %v270_v13 = vmul.f32 %v268_v0, %v1776_v11  ;;  %v305_v17 = vmul.f32 %v303_v5, %v1776_v11 }
  0x23   : > { %v271_v10 = vmul.f32 %v268_v0, %v1769_v7  ;;  %v307_v14 = vmul.f32 %v303_v5, %v1778_v12  ;;  %v272_v15 = vmul.f32 %v268_v0, %v1778_v12  ;;  %v339_v18 = vmul.f32 %v337_v16, %v1776_v11  ;;  %s1553_s27 = sld [smem:[#allocation2 + $0x84]]  ;;  %s1695_s17 = smov 122  }
  0x24   : > { %279 = vrot.lane.b32.xlu0 %v269_v8, %s1690_s10  ;;  %v306_v19 = vmul.f32 %v303_v5, %v1769_v7  ;;  %v338_v22 = vmul.f32 %v337_v16, %v1767_v6  ;;  %v340_v24 = vmul.f32 %v337_v16, %v1769_v7  ;;  %v374_v25 = vmul.f32 %v371_v23, %v1769_v7  ;;  %s1554_s29 = sld [smem:[#allocation2 + $0x104]] }
  0x25   : > { %314 = vrot.lane.b32.xlu2 %v304_v9, %s1690_s10  ;;  %283 = vrot.lane.b32.xlu1 %v271_v10, %s1690_s10  ;;  %v341_v26 = vmul.f32 %v337_v16, %v1778_v12  ;;  %v372_v28 = vmul.f32 %v371_v23, %v1767_v6  ;;  %v407_v29 = vmul.f32 %v406_v27, %v1767_v6  ;;  %v440_v34 = vstv %s1548_s21  ;;  %s1555_s30 = sld [smem:[#allocation2 + $0x5]] }
  0x26   : > { %v373_v30 = vmul.f32 %v371_v23, %v1776_v11  ;;  %v375_v31 = vmul.f32 %v371_v23, %v1778_v12  ;;  %v410_v32 = vmul.f32 %v406_v27, %v1778_v12  ;;  %v408_v35 = vmul.f32 %v406_v27, %v1776_v11  ;;  %s249_s4 = sld [smem:[#allocation2]] }
  0x27   : > { %v442_v36 = vmul.f32 %v440_v34, %v1776_v11  ;;  %v409_v37 = vmul.f32 %v406_v27, %v1769_v7  ;;  %v411_v38 = vmul.f32 %v406_v27, %v1760_v1  ;;  %v445_v39 = vmul.f32 %v440_v34, %v1760_v1  ;;  %s1556_s6 = sld [smem:[#allocation2 + $0x85]] }
  0x28   : > { %v441_v40 = vmul.f32 %v440_v34, %v1767_v6  ;;  %v474_v41 = vstv %s1549_s22  ;;  %v443_v42 = vmul.f32 %v440_v34, %v1769_v7  ;;  %v444_v44 = vmul.f32 %v440_v34, %v1778_v12  ;;  %s1541_s8 = sld [smem:[#allocation2 + $0x80]] }
  0x29   : > { %v477_v43 = vmul.f32 %v474_v41, %v1769_v7  ;;  %v509_v45 = vstv %s1550_s23  ;;  %v475_v46 = vmul.f32 %v474_v41, %v1767_v6  ;;  %v476_v48 = vmul.f32 %v474_v41, %v1776_v11  ;;  %s1557_s9 = sld [smem:[#allocation2 + $0x105]]  ;;  %s1696_s23 = smov 121  }
  0x2a   : > { %v510_v47 = vmul.f32 %v509_v45, %v1767_v6  ;;  %v478_v50 = vmul.f32 %v474_v41, %v1778_v12  ;;  %v513_v51 = vmul.f32 %v509_v45, %v1778_v12  ;;  %v479_v52 = vmul.f32 %v474_v41, %v1760_v1  ;;  %s1558_s11 = sld [smem:[#allocation2 + $0x6]] }
  0x2b   : > { %v543_v53 = vstv %s1551_s25  ;;  %v511_v55 = vmul.f32 %v509_v45, %v1776_v11  ;;  %v512_v57 = vmul.f32 %v509_v45, %v1769_v7  ;;  %v514_v59 = vmul.f32 %v509_v45, %v1760_v1  ;;  %s1559_s14 = sld [smem:[#allocation2 + $0x86]] }
  0x2c   : > { %281 = vrot.lane.b32.xlu0 %v270_v13, %s1690_s10  ;;  %v545_v56 = vmul.f32 %v543_v53, %v1776_v11  ;;  %v548_v60 = vmul.f32 %v543_v53, %v1760_v1  ;;  %v544_v61 = vmul.f32 %v543_v53, %v1767_v6  ;;  %v577_v62 = vstv %s1552_s26  ;;  %s1561_s21 = sld [smem:[#allocation2 + $0x7]] }
  0x2d   : > { %320 = vrot.lane.b32.xlu2 %v307_v14, %s1690_s10  ;;  %285 = vrot.lane.b32.xlu1 %v272_v15, %s1690_s10  ;;  %v546_v0 = vmul.f32 %v543_v53, %v1769_v7  ;;  %v580_v2 = vmul.f32 %v577_v62, %v1769_v7  ;;  %v547_v3 = vmul.f32 %v543_v53, %v1778_v12  ;;  %v612_v4 = vstv %s1553_s27  ;;  %s1562_s22 = sld [smem:[#allocation2 + $0x87]]  ;;  %s1697_s27 = smov 120  }
  0x2e   : > { %v578_v10 = vmul.f32 %v577_v62, %v1767_v6  ;;  %v613_v13 = vmul.f32 %v612_v4, %v1767_v6  ;;  %v579_v14 = vmul.f32 %v577_v62, %v1776_v11  ;;  %s1564_s25 = sld [smem:[#allocation2 + $0x8]] }
  0x2f   : > { %s1565_s26 = sld [smem:[#allocation2 + $0x88]] }
  0x34   : > { %316 = vrot.lane.b32.xlu0 %v305_v17, %s1690_s10 }
  0x35   : > { %350 = vrot.lane.b32.xlu2 %v339_v18, %s1690_s10  ;;  %318 = vrot.lane.b32.xlu1 %v306_v19, %s1690_s10  ;;  %v581_v18 = vmul.f32 %v577_v62, %v1778_v12  ;;  %v616_v19 = vmul.f32 %v612_v4, %v1778_v12 }
  0x3c   : > { %322 = vrot.lane.b32.xlu0 %v308_v20, %s1690_s10  ;;  %v582_v20 = vmul.f32 %v577_v62, %v1760_v1 }
  0x3d   : > { %356 = vrot.lane.b32.xlu2 %v342_v21, %s1690_s10  ;;  %348 = vrot.lane.b32.xlu1 %v338_v22, %s1690_s10  ;;  %v646_v21 = vstv %s1554_s29  ;;  %s1567_s29 = sld [smem:[#allocation2 + $0x9]] }
  0x44   : > { %352 = vrot.lane.b32.xlu0 %v340_v24, %s1690_s10 }
  0x45   : > { %386 = vrot.lane.b32.xlu2 %v374_v25, %s1691_s18  ;;  %354 = vrot.lane.b32.xlu1 %v341_v26, %s1690_s10  ;;  %s1542_s10 = sld [smem:[#allocation2 + $0x100]] }
  0x4c   : > { %382 = vrot.lane.b32.xlu0 %v372_v28, %s1691_s18  ;;  %v614_v28 = vmul.f32 %v612_v4, %v1776_v11 }
  0x4d   : > { %417 = vrot.lane.b32.xlu2 %v407_v29, %s1691_s18  ;;  %384 = vrot.lane.b32.xlu1 %v373_v30, %s1691_s18  ;;  %v648_v29 = vmul.f32 %v646_v21, %v1776_v11  ;;  %v615_v30 = vmul.f32 %v612_v4, %v1769_v7 }
  0x54   : > { %388 = vrot.lane.b32.xlu0 %v375_v31, %s1691_s18 }
  0x55   : > { %423 = vrot.lane.b32.xlu2 %v410_v32, %s1691_s18  ;;  %390 = vrot.lane.b32.xlu1 %v376_v33, %s1691_s18 }
  0x5c   : > { %419 = vrot.lane.b32.xlu0 %v408_v35, %s1691_s18 }
  0x5d   : > { %453 = vrot.lane.b32.xlu2 %v442_v36, %s1691_s18  ;;  %421 = vrot.lane.b32.xlu1 %v409_v37, %s1691_s18  ;;  %v617_v36 = vmul.f32 %v612_v4, %v1760_v1  ;;  %v651_v37 = vmul.f32 %v646_v21, %v1760_v1 }
  0x64   : > { %425 = vrot.lane.b32.xlu0 %v411_v38, %s1691_s18  ;;  %v647_v38 = vmul.f32 %v646_v21, %v1767_v6 }
  0x65   : > { %459 = vrot.lane.b32.xlu2 %v445_v39, %s1691_s18  ;;  %451 = vrot.lane.b32.xlu1 %v441_v40, %s1691_s18  ;;  %v680_v39 = vstv %s1555_s30  ;;  %s1568_s30 = sld [smem:[#allocation2 + $0x89]] }
  0x66   : > { %v682_v4 = vmul.f32 %v680_v39, %v1776_v11 }
  0x6c   : > { %455 = vrot.lane.b32.xlu0 %v443_v42, %s1691_s18  ;;  %v250_v42 = vstv %s249_s4  ;;  %s1698_s4 = smov 119  }
  0x6d   : > { %489 = vrot.lane.b32.xlu2 %v477_v43, %s1692_s24  ;;  %457 = vrot.lane.b32.xlu1 %v444_v44, %s1691_s18  ;;  %s1560_s18 = sld [smem:[#allocation2 + $0x106]] }
  0x74   : > { %485 = vrot.lane.b32.xlu0 %v475_v46, %s1692_s24 }
  0x75   : > { %520 = vrot.lane.b32.xlu2 %v510_v47, %s1692_s24  ;;  %487 = vrot.lane.b32.xlu1 %v476_v48, %s1692_s24  ;;  %v649_v47 = vmul.f32 %v646_v21, %v1769_v7  ;;  %v683_v48 = vmul.f32 %v680_v39, %v1769_v7 }
  0x77   : > { %v1841_v49 = vpop.permute.xlu2 %287 }
  0x7c   : > { %491 = vrot.lane.b32.xlu0 %v478_v50, %s1692_s24  ;;  %v650_v50 = vmul.f32 %v646_v21, %v1778_v12 }
  0x7d   : > { %526 = vrot.lane.b32.xlu2 %v513_v51, %s1692_s24  ;;  %493 = vrot.lane.b32.xlu1 %v479_v52, %s1692_s24  ;;  %v252_v51 = vmul.f32 %v250_v42, %v1776_v11  ;;  %v251_v52 = vmul.f32 %v250_v42, %v1767_v6 }
  0x7f   : > { %v315_v54 = vpop.permute.xlu2 %314 }
  0x84   : > { %522 = vrot.lane.b32.xlu0 %v511_v55, %s1692_s24  ;;  %v1938_v55 = vstv %s1556_s6  ;;  %s1569_s6 = sld [smem:[#allocation2 + $0x109]] }
  0x85   : > { %556 = vrot.lane.b32.xlu2 %v545_v56, %s1692_s24  ;;  %524 = vrot.lane.b32.xlu1 %v512_v57, %s1692_s24 }
  0x87   : > { %v321_v58 = vpop.permute.xlu2 %320 }
  0x8c   : > { %528 = vrot.lane.b32.xlu0 %v514_v59, %s1692_s24 }
  0x8d   : > { %562 = vrot.lane.b32.xlu2 %v548_v60, %s1692_s24  ;;  %554 = vrot.lane.b32.xlu1 %v544_v61, %s1692_s24 }
  0x8f   : > { %v351_v63 = vpop.permute.xlu2 %350 }
  0x94   : > { %558 = vrot.lane.b32.xlu0 %v546_v0, %s1692_s24  ;;  %v716_v0 = vmul.f32 %v1938_v55, %v1767_v6 }
  0x95   : > { %592 = vrot.lane.b32.xlu2 %v580_v2, %s1693_s28  ;;  %560 = vrot.lane.b32.xlu1 %v547_v3, %s1692_s24  ;;  %s1563_s24 = sld [smem:[#allocation2 + $0x107]] }
  0x96   : > { %v280_v5 = vpop.permute.xlu0 %279 }
  0x97   : > { %v357_v8 = vpop.permute.xlu2 %356  ;;  %v1867_v9 = vpop.permute.xlu1 %283 }
  0x9c   : > { %588 = vrot.lane.b32.xlu0 %v578_v10, %s1693_s28 }
  0x9d   : > { %623 = vrot.lane.b32.xlu2 %v613_v13, %s1693_s28  ;;  %590 = vrot.lane.b32.xlu1 %v579_v14, %s1693_s28 }
  0x9e   : > { %v282_v15 = vpop.permute.xlu0 %281 }
  0x9f   : > { %v1875_v16 = vpop.permute.xlu2 %386  ;;  %v1877_v17 = vpop.permute.xlu1 %285  ;;  %v290_v53 = vsel %vm289_vm0, %v280_v5, %v282_v15  ;;  %v253_v5 = vmul.f32 %v250_v42, %v1769_v7 }
  0xa0   : > { %v292_v10 = vsel %vm289_vm0, %v1867_v9, %v1877_v17  ;;  %v293_v13 = vsel %vm289_vm0, %v1877_v17, %v1841_v49 }
  0xa1   : > { %v300_v14 = vadd.f32 %v292_v10, %v253_v5 }
  0xa4   : > { %594 = vrot.lane.b32.xlu0 %v581_v18, %s1693_s28 }
  0xa5   : > { %629 = vrot.lane.b32.xlu2 %v616_v19, %s1693_s28  ;;  %596 = vrot.lane.b32.xlu1 %v582_v20, %s1693_s28  ;;  %v256_v20 = vstv %s1541_s8  ;;  %s1699_s8 = smov 118  }
  0xa6   : > { %v317_v22 = vpop.permute.xlu0 %316 }
  0xa7   : > { %v1885_v23 = vpop.permute.xlu2 %417  ;;  %v319_v24 = vpop.permute.xlu1 %318  ;;  %v1888_v25 = vsel %vm289_vm0, %v315_v54, %v317_v22  ;;  %v291_v54 = vsel %vm289_vm0, %v282_v15, %v1867_v9 }
  0xa8   : > { %v1891_v26 = vsel %vm289_vm0, %v319_v24, %v321_v58  ;;  %v1894_v27 = vsel %vm289_vm0, %v317_v22, %v319_v24  ;;  %v299_v59 = vadd.f32 %v291_v54, %v252_v51  ;;  %v684_v22 = vmul.f32 %v680_v39, %v1778_v12 }
  0xa9   : > { %v719_v24 = vmul.f32 %v1938_v55, %v1778_v12 }
  0xac   : > { %625 = vrot.lane.b32.xlu0 %v614_v28, %s1693_s28 }
  0xad   : > { %659 = vrot.lane.b32.xlu2 %v648_v29, %s1693_s28  ;;  %627 = vrot.lane.b32.xlu1 %v615_v30, %s1693_s28  ;;  %v685_v29 = vmul.f32 %v680_v39, %v1760_v1  ;;  %v257_v30 = vmul.f32 %v256_v20, %v1767_v6 }
  0xae   : > { %v323_v31 = vpop.permute.xlu0 %322 }
  0xaf   : > { %v1902_v32 = vpop.permute.xlu2 %423  ;;  %v349_v33 = vpop.permute.xlu1 %348  ;;  %v1905_v34 = vsel %vm289_vm0, %v321_v58, %v323_v31  ;;  %v298_v58 = vadd.f32 %v290_v53, %v251_v52  ;;  %v259_v31 = vmul.f32 %v256_v20, %v1769_v7 }
  0xb0   : > { %v1908_v35 = vsel %vm289_vm0, %v349_v33, %v351_v63  ;;  %v258_v33 = vmul.f32 %v256_v20, %v1776_v11 }
  0xb4   : > { %631 = vrot.lane.b32.xlu0 %v617_v36, %s1693_s28  ;;  %v332_v36 = vadd.f32 %v1888_v25, %v257_v30 }
  0xb5   : > { %665 = vrot.lane.b32.xlu2 %v651_v37, %s1693_s28  ;;  %657 = vrot.lane.b32.xlu1 %v647_v38, %s1693_s28  ;;  %v262_v37 = vstv %s1542_s10  ;;  %s207_s10 = sand.u32 1, %s1679_s12  }
  0xb6   : > { %v353_v40 = vpop.permute.xlu0 %352  ;;  %v263_v54 = vmul.f32 %v262_v37, %v1767_v6  ;;  %v266_v10 = vmul.f32 %v262_v37, %v1778_v12  ;;  %s1536_s12 = sshll.u32 %s207_s10, 6 }
  0xb7   : > { %v1916_v41 = vpop.permute.xlu2 %453  ;;  %v355_v43 = vpop.permute.xlu1 %354  ;;  %v1919_v44 = vsel %vm289_vm0, %v351_v63, %v353_v40  ;;  %v681_v63 = vmul.f32 %v680_v39, %v1767_v6  ;;  %v334_v39 = vadd.f32 %v1891_v26, %v259_v31 }
  0xb8   : > { %v1922_v45 = vsel %vm289_vm0, %v355_v43, %v357_v8  ;;  %v1925_v46 = vsel %vm289_vm0, %v353_v40, %v355_v43  ;;  %v254_v8 = vmul.f32 %v250_v42, %v1778_v12  ;;  %v333_v42 = vadd.f32 %v1894_v27, %v258_v33 }
  0xb9   : > { %v718_v27 = vmul.f32 %v1938_v55, %v1769_v7  ;;  %vm1310_vm0 = vcmask 1041409  }
  0xba   : > { %v301_v19 = vadd.f32 %v293_v13, %v254_v8  ;;  %v783_v13 = vstv %s1558_s11  ;;  %s2641_s11 = scalar_lea.vmem [#allocation4], %s1536_s12 }
  0xbc   : > { %661 = vrot.lane.b32.xlu0 %v649_v47, %s1693_s28 }
  0xbd   : > { %695 = vrot.lane.b32.xlu2 %v683_v48, %s1694_s7  ;;  %663 = vrot.lane.b32.xlu1 %v650_v50, %s1693_s28  ;;  %v717_v48 = vmul.f32 %v1938_v55, %v1776_v11  ;;  %s1566_s28 = sld [smem:[#allocation2 + $0x108]] }
  0xbe   : > { %v383_v56 = vpop.permute.xlu0 %382 }
  0xbf   : > { %v1940_v57 = vpop.permute.xlu2 %459  ;;  %v385_v60 = vpop.permute.xlu1 %384 }
  0xc0   : > { %v394_v61 = vsel %vm392_vm1, %v385_v60, %v1875_v16  ;;  %v393_v62 = vsel %vm392_vm1, %v383_v56, %v385_v60  ;;  %v366_v60 = vadd.f32 %v1908_v35, %v263_v54  ;;  %v264_v35 = vmul.f32 %v262_v37, %v1776_v11 }
  0xc1   : > { %v1948_v2 = vadd.f32 %v394_v61, %v299_v59  ;;  %v1950_v3 = vadd.f32 %v393_v62, %v298_v58  ;;  %v788_v54 = vmul.f32 %v783_v13, %v1760_v1 }
  0xc4   : > { %691 = vrot.lane.b32.xlu0 %v681_v63, %s1694_s7 }
  0xc5   : > { %726 = vrot.lane.b32.xlu2 %v716_v0, %s1694_s7  ;;  %693 = vrot.lane.b32.xlu1 %v682_v4, %s1694_s7  ;;  %v720_v4 = vmul.f32 %v1938_v55, %v1760_v1  ;;  %v367_v55 = vadd.f32 %v1919_v44, %v264_v35  ;;  %v786_v44 = vmul.f32 %v783_v13, %v1769_v7 }
  0xc6   : > { %v389_v15 = vpop.permute.xlu0 %388 }
  0xc7   : > { %v1964_v18 = vpop.permute.xlu2 %489  ;;  %v391_v21 = vpop.permute.xlu1 %390  ;;  %v395_v9 = vsel %vm392_vm1, %v1875_v16, %v389_v15  ;;  %v749_v16 = vstv %s1557_s9  ;;  %s1572_s9 = sld [smem:[#allocation2 + $0x10a]] }
  0xc8   : > { %v396_v49 = vsel %vm392_vm1, %v389_v15, %v391_v21  ;;  %v1969_v17 = vadd.f32 %v395_v9, %v300_v14  ;;  %v751_v52 = vmul.f32 %v749_v16, %v1776_v11  ;;  %v754_v5 = vmul.f32 %v749_v16, %v1760_v1 }
  0xc9   : > { %v1974_v28 = vadd.f32 %v396_v49, %v301_v19  ;;  %v750_v8 = vmul.f32 %v749_v16, %v1767_v6  ;;  %v369_v19 = vadd.f32 %v1922_v45, %v266_v10  ;;  %v752_v49 = vmul.f32 %v749_v16, %v1769_v7 }
  0xcc   : > { %697 = vrot.lane.b32.xlu0 %v684_v22, %s1694_s7 }
  0xcd   : > { %732 = vrot.lane.b32.xlu2 %v719_v24, %s1694_s7  ;;  %699 = vrot.lane.b32.xlu1 %v685_v29, %s1694_s7 }
  0xce   : > { %v420_v38 = vpop.permute.xlu0 %419 }
  0xcf   : > { %v1984_v40 = vpop.permute.xlu2 %520  ;;  %v422_v43 = vpop.permute.xlu1 %421  ;;  %v427_v47 = vsel %vm392_vm1, %v1885_v23, %v420_v38  ;;  %v260_v23 = vmul.f32 %v256_v20, %v1778_v12 }
  0xd0   : > { %v429_v50 = vsel %vm392_vm1, %v422_v43, %v1902_v32  ;;  %v428_v25 = vsel %vm392_vm1, %v420_v38, %v422_v43  ;;  %v1995_v51 = vadd.f32 %v427_v47, %v332_v36  ;;  %v785_v43 = vmul.f32 %v783_v13, %v1776_v11 }
  0xd1   : > { %v1998_v53 = vadd.f32 %v429_v50, %v334_v39  ;;  %v2000_v26 = vadd.f32 %v428_v25, %v333_v42  ;;  %v335_v56 = vadd.f32 %v1905_v34, %v260_v23 }
  0xd4   : > { %728 = vrot.lane.b32.xlu0 %v717_v48, %s1694_s7 }
  0xd5   : > { %762 = vrot.lane.b32.xlu2 %v751_v52, %s1694_s7  ;;  %730 = vrot.lane.b32.xlu1 %v718_v27, %s1694_s7  ;;  %v787_v52 = vmul.f32 %v783_v13, %v1778_v12 }
  0xd6   : > { %v426_v58 = vpop.permute.xlu0 %425 }
  0xd7   : > { %v2010_v59 = vpop.permute.xlu2 %526  ;;  %v452_v61 = vpop.permute.xlu1 %451  ;;  %v430_v62 = vsel %vm392_vm1, %v1902_v32, %v426_v58  ;;  %v265_v32 = vmul.f32 %v262_v37, %v1769_v7 }
  0xd8   : > { %v461_v63 = vsel %vm392_vm1, %v452_v61, %v1916_v41  ;;  %v2017_v0 = vadd.f32 %v430_v62, %v335_v56 }
  0xd9   : > { %v2022_v34 = vadd.f32 %v461_v63, %v366_v60  ;;  %v368_v20 = vadd.f32 %v1925_v46, %v265_v32  ;;  %v753_v46 = vmul.f32 %v749_v16, %v1778_v12  ;;  %v784_v16 = vmul.f32 %v783_v13, %v1767_v6 }
  0xdc   : > { %734 = vrot.lane.b32.xlu0 %v720_v4, %s1694_s7 }
  0xdd   : > { %768 = vrot.lane.b32.xlu2 %v754_v5, %s1694_s7  ;;  %760 = vrot.lane.b32.xlu1 %v750_v8, %s1694_s7 }
  0xde   : > { %v456_v14 = vpop.permute.xlu0 %455 }
  0xdf   : > { %v2032_v15 = vpop.permute.xlu2 %556  ;;  %v458_v21 = vpop.permute.xlu1 %457  ;;  %v462_v9 = vsel %vm392_vm1, %v1916_v41, %v456_v14  ;;  %v818_v41 = vstv %s1559_s14  ;;  %s1595_s14 = sshll.u32 (%p1745_p4), %s1733_s15, 4 }
  0xe0   : > { %v464_v22 = vsel %vm392_vm1, %v458_v21, %v1940_v57  ;;  %v463_v24 = vsel %vm392_vm1, %v456_v14, %v458_v21  ;;  %v2042_v29 = vadd.f32 %v462_v9, %v367_v55  ;;  %v819_v38 = vmul.f32 %v818_v41, %v1767_v6 }
  0xe1   : > { %v2045_v30 = vadd.f32 %v464_v22, %v369_v19  ;;  %v2047_v45 = vadd.f32 %v463_v24, %v368_v20  ;;  %v822_v27 = vmul.f32 %v818_v41, %v1778_v12  ;;  %v820_v61 = vmul.f32 %v818_v41, %v1776_v11 }
  0xe2   : > { %v823_v13 = vmul.f32 %v818_v41, %v1760_v1  ;;  %vm1314_vm1 = vcmask 1042433  }
  0xe4   : > { %764 = vrot.lane.b32.xlu0 %v752_v49, %s1694_s7 }
  0xe5   : > { %798 = vrot.lane.b32.xlu2 %v786_v44, %s1695_s17  ;;  %766 = vrot.lane.b32.xlu1 %v753_v46, %s1694_s7  ;;  %s1571_s7 = sld [smem:[#allocation2 + $0x8a]] }
  0xe6   : > { %v486_v57 = vpop.permute.xlu0 %485 }
  0xe7   : > { %v2053_v31 = vpop.permute.xlu2 %562  ;;  %v488_v33 = vpop.permute.xlu1 %487 }
  0xe8   : > { %v497_v36 = vsel %vm495_vm2, %v488_v33, %v1964_v18  ;;  %v496_v37 = vsel %vm495_vm2, %v486_v57, %v488_v33 }
  0xe9   : > { %v2061_v39 = vadd.f32 %v497_v36, %v1948_v2  ;;  %v2064_v42 = vadd.f32 %v496_v37, %v1950_v3 }
  0xec   : > { %794 = vrot.lane.b32.xlu0 %v784_v16, %s1695_s17 }
  0xed   : > { %829 = vrot.lane.b32.xlu2 %v819_v38, %s1695_s17  ;;  %796 = vrot.lane.b32.xlu1 %v785_v43, %s1695_s17 }
  0xee   : > { %v492_v47 = vpop.permute.xlu0 %491 }
  0xef   : > { %v2070_v48 = vpop.permute.xlu2 %592  ;;  %v494_v50 = vpop.permute.xlu1 %493  ;;  %v498_v2 = vsel %vm495_vm2, %v1964_v18, %v492_v47  ;;  %v852_v18 = vstv %s1560_s18 }
  0xf0   : > { %v499_v25 = vsel %vm495_vm2, %v492_v47, %v494_v50  ;;  %v2076_v3 = vadd.f32 %v498_v2, %v1969_v17  ;;  %v854_v4 = vmul.f32 %v852_v18, %v1776_v11  ;;  %v857_v55 = vmul.f32 %v852_v18, %v1760_v1 }
  0xf1   : > { %v2081_v23 = vadd.f32 %v499_v25, %v1974_v28  ;;  %v853_v19 = vmul.f32 %v852_v18, %v1767_v6 }
  0xf4   : > { %800 = vrot.lane.b32.xlu0 %v787_v52, %s1695_s17 }
  0xf5   : > { %835 = vrot.lane.b32.xlu2 %v822_v27, %s1695_s17  ;;  %802 = vrot.lane.b32.xlu1 %v788_v54, %s1695_s17 }
  0xf6   : > { %v523_v56 = vpop.permute.xlu0 %522 }
  0xf7   : > { %v2087_v58 = vpop.permute.xlu2 %623  ;;  %v525_v17 = vpop.permute.xlu1 %524  ;;  %v530_v60 = vsel %vm495_vm2, %v1984_v40, %v523_v56  ;;  %v821_v40 = vmul.f32 %v818_v41, %v1769_v7 }
  0xf8   : > { %v532_v28 = vsel %vm495_vm2, %v525_v17, %v2010_v59  ;;  %v531_v62 = vsel %vm495_vm2, %v523_v56, %v525_v17  ;;  %v2096_v63 = vadd.f32 %v530_v60, %v1995_v51 }
  0xf9   : > { %v2100_v5 = vadd.f32 %v532_v28, %v1998_v53  ;;  %v2103_v8 = vadd.f32 %v531_v62, %v2000_v26 }
  0xfc   : > { %831 = vrot.lane.b32.xlu0 %v820_v61, %s1695_s17 }
  0xfd   : > { %865 = vrot.lane.b32.xlu2 %v854_v4, %s1695_s17  ;;  %833 = vrot.lane.b32.xlu1 %v821_v40, %s1695_s17 }
  0xfe   : > { %v529_v35 = vpop.permute.xlu0 %528 }
  0xff   : > { %v2109_v51 = vpop.permute.xlu2 %629  ;;  %v555_v10 = vpop.permute.xlu1 %554  ;;  %v533_v53 = vsel %vm495_vm2, %v2010_v59, %v529_v35  ;;  %v886_v59 = vstv %s1561_s21  ;;  %s1421_s21 = scalar_lea.vmem (%p1745_p4), %s2736_s3, %s1595_s14 }
 0x100   : > { %v564_v26 = vsel %vm495_vm2, %v555_v10, %v2032_v15  ;;  %v2116_v32 = vadd.f32 %v533_v53, %v2017_v0  ;;  %v889_v44 = vmul.f32 %v886_v59, %v1769_v7  ;;  %v887_v36 = vmul.f32 %v886_v59, %v1767_v6 }
 0x101   : > { %v2121_v14 = vadd.f32 %v564_v26, %v2022_v34  ;;  %v855_v34 = vmul.f32 %v852_v18, %v1769_v7  ;;  %v888_v43 = vmul.f32 %v886_v59, %v1776_v11  ;;  %v890_v52 = vmul.f32 %v886_v59, %v1778_v12 }
 0x104   : > { %837 = vrot.lane.b32.xlu0 %v823_v13, %s1695_s17 }
 0x105   : > { %871 = vrot.lane.b32.xlu2 %v857_v55, %s1695_s17  ;;  %863 = vrot.lane.b32.xlu1 %v853_v19, %s1695_s17 }
 0x106   : > { %v559_v20 = vpop.permute.xlu0 %558 }
 0x107   : > { %v2127_v0 = vpop.permute.xlu2 %659  ;;  %v561_v21 = vpop.permute.xlu1 %560  ;;  %v565_v9 = vsel %vm495_vm2, %v2032_v15, %v559_v20  ;;  %v856_v15 = vmul.f32 %v852_v18, %v1778_v12  ;;  %v891_v18 = vmul.f32 %v886_v59, %v1760_v1 }
 0x108   : > { %v567_v49 = vsel %vm495_vm2, %v561_v21, %v2053_v31  ;;  %v566_v22 = vsel %vm495_vm2, %v559_v20, %v561_v21  ;;  %v2136_v24 = vadd.f32 %v565_v9, %v2042_v29  ;;  %v921_v29 = vstv %s1562_s22 }
 0x109   : > { %v2140_v46 = vadd.f32 %v567_v49, %v2045_v30  ;;  %v2143_v41 = vadd.f32 %v566_v22, %v2047_v45  ;;  %v922_v37 = vmul.f32 %v921_v29, %v1767_v6  ;;  %v925_v27 = vmul.f32 %v921_v29, %v1778_v12 }
 0x10a   : > { %v923_v61 = vmul.f32 %v921_v29, %v1776_v11  ;;  %v926_v13 = vmul.f32 %v921_v29, %v1760_v1  ;;  %vm1320_vm2 = vcmask 1043458  }
 0x10c   : > { %867 = vrot.lane.b32.xlu0 %v855_v34, %s1695_s17 }
 0x10d   : > { %901 = vrot.lane.b32.xlu2 %v889_v44, %s1696_s23  ;;  %869 = vrot.lane.b32.xlu1 %v856_v15, %s1695_s17 }
 0x10e   : > { %v589_v57 = vpop.permute.xlu0 %588 }
 0x10f   : > { %v2149_v31 = vpop.permute.xlu2 %665  ;;  %v591_v33 = vpop.permute.xlu1 %590 }
 0x110   : > { %v600_v30 = vsel %vm598_vm3, %v591_v33, %v2070_v48  ;;  %v599_v45 = vsel %vm598_vm3, %v589_v57, %v591_v33 }
 0x111   : > { %v2157_v16 = vadd.f32 %v600_v30, %v2061_v39  ;;  %v2160_v38 = vadd.f32 %v599_v45, %v2064_v42 }
 0x114   : > { %897 = vrot.lane.b32.xlu0 %v887_v36, %s1696_s23 }
 0x115   : > { %932 = vrot.lane.b32.xlu2 %v922_v37, %s1696_s23  ;;  %899 = vrot.lane.b32.xlu1 %v888_v43, %s1696_s23 }
 0x116   : > { %v595_v47 = vpop.permute.xlu0 %594 }
 0x117   : > { %v2166_v50 = vpop.permute.xlu2 %695  ;;  %v597_v2 = vpop.permute.xlu1 %596  ;;  %v601_v39 = vsel %vm598_vm3, %v2070_v48, %v595_v47  ;;  %v955_v48 = vstv %s1563_s24 }
 0x118   : > { %v602_v25 = vsel %vm598_vm3, %v595_v47, %v597_v2  ;;  %v2172_v42 = vadd.f32 %v601_v39, %v2076_v3  ;;  %v957_v4 = vmul.f32 %v955_v48, %v1776_v11  ;;  %v960_v55 = vmul.f32 %v955_v48, %v1760_v1 }
 0x119   : > { %v2177_v54 = vadd.f32 %v602_v25, %v2081_v23  ;;  %v956_v59 = vmul.f32 %v955_v48, %v1767_v6 }
 0x11c   : > { %903 = vrot.lane.b32.xlu0 %v890_v52, %s1696_s23 }
 0x11d   : > { %938 = vrot.lane.b32.xlu2 %v925_v27, %s1696_s23  ;;  %905 = vrot.lane.b32.xlu1 %v891_v18, %s1696_s23 }
 0x11e   : > { %v626_v56 = vpop.permute.xlu0 %625 }
 0x11f   : > { %v2183_v17 = vpop.permute.xlu2 %726  ;;  %v628_v3 = vpop.permute.xlu1 %627  ;;  %v633_v60 = vsel %vm598_vm3, %v2087_v58, %v626_v56  ;;  %v924_v58 = vmul.f32 %v921_v29, %v1769_v7 }
 0x120   : > { %v635_v23 = vsel %vm598_vm3, %v628_v3, %v2109_v51  ;;  %v634_v28 = vsel %vm598_vm3, %v626_v56, %v628_v3  ;;  %v2192_v62 = vadd.f32 %v633_v60, %v2096_v63 }
 0x121   : > { %v2196_v40 = vadd.f32 %v635_v23, %v2100_v5  ;;  %v2199_v35 = vadd.f32 %v634_v28, %v2103_v8 }
 0x124   : > { %934 = vrot.lane.b32.xlu0 %v923_v61, %s1696_s23 }
 0x125   : > { %968 = vrot.lane.b32.xlu2 %v957_v4, %s1696_s23  ;;  %936 = vrot.lane.b32.xlu1 %v924_v58, %s1696_s23 }
 0x126   : > { %v632_v10 = vpop.permute.xlu0 %631 }
 0x127   : > { %v2205_v63 = vpop.permute.xlu2 %732  ;;  %v658_v53 = vpop.permute.xlu1 %657  ;;  %v636_v5 = vsel %vm598_vm3, %v2109_v51, %v632_v10  ;;  %v989_v51 = vstv %s1564_s25 }
 0x128   : > { %v667_v8 = vsel %vm598_vm3, %v658_v53, %v2127_v0  ;;  %v2212_v26 = vadd.f32 %v636_v5, %v2116_v32  ;;  %v992_v44 = vmul.f32 %v989_v51, %v1769_v7  ;;  %v990_v30 = vmul.f32 %v989_v51, %v1767_v6 }
 0x129   : > { %v2217_v19 = vadd.f32 %v667_v8, %v2121_v14  ;;  %v958_v14 = vmul.f32 %v955_v48, %v1769_v7  ;;  %v991_v43 = vmul.f32 %v989_v51, %v1776_v11  ;;  %v993_v52 = vmul.f32 %v989_v51, %v1778_v12 }
 0x12c   : > { %940 = vrot.lane.b32.xlu0 %v926_v13, %s1696_s23 }
 0x12d   : > { %974 = vrot.lane.b32.xlu2 %v960_v55, %s1696_s23  ;;  %966 = vrot.lane.b32.xlu1 %v956_v59, %s1696_s23 }
 0x12e   : > { %v662_v20 = vpop.permute.xlu0 %661 }
 0x12f   : > { %v2223_v32 = vpop.permute.xlu2 %762  ;;  %v664_v21 = vpop.permute.xlu1 %663  ;;  %v668_v9 = vsel %vm598_vm3, %v2127_v0, %v662_v20  ;;  %v959_v0 = vmul.f32 %v955_v48, %v1778_v12  ;;  %v994_v48 = vmul.f32 %v989_v51, %v1760_v1 }
 0x130   : > { %v670_v34 = vsel %vm598_vm3, %v664_v21, %v2149_v31  ;;  %v669_v49 = vsel %vm598_vm3, %v662_v20, %v664_v21  ;;  %v2232_v22 = vadd.f32 %v668_v9, %v2136_v24  ;;  %v1024_v24 = vstv %s1565_s26 }
 0x131   : > { %v2236_v15 = vadd.f32 %v670_v34, %v2140_v46  ;;  %v2239_v29 = vadd.f32 %v669_v49, %v2143_v41  ;;  %v1025_v45 = vmul.f32 %v1024_v24, %v1767_v6  ;;  %v1028_v27 = vmul.f32 %v1024_v24, %v1778_v12 }
 0x132   : > { %v1026_v61 = vmul.f32 %v1024_v24, %v1776_v11  ;;  %v1029_v8 = vmul.f32 %v1024_v24, %v1760_v1  ;;  %vm1326_vm3 = vcmask 1044483  }
 0x134   : > { %970 = vrot.lane.b32.xlu0 %v958_v14, %s1696_s23  ;;  %v2330_v14 = vld.sshfl [vmem:[#allocation1 + $0x10] sm:$0xff pattern:$0x75316420] }
 0x135   : > { %1004 = vrot.lane.b32.xlu2 %v992_v44, %s1697_s27  ;;  %972 = vrot.lane.b32.xlu1 %v959_v0, %s1696_s23 }
 0x136   : > { %v692_v57 = vpop.permute.xlu0 %691 }
 0x137   : > { %v2245_v31 = vpop.permute.xlu2 %768  ;;  %v694_v33 = vpop.permute.xlu1 %693 }
 0x138   : > { %v703_v46 = vsel %vm701_vm4, %v694_v33, %v2166_v50  ;;  %v702_v41 = vsel %vm701_vm4, %v692_v57, %v694_v33  ;;  %v2348_v57 = vld.sshfl [vmem:[#allocation1] sm:$0xff pattern:$0x75316420] }
 0x139   : > { %v2253_v36 = vadd.f32 %v703_v46, %v2157_v16  ;;  %v2256_v37 = vadd.f32 %v702_v41, %v2160_v38  ;;  %v2358_v41 = vld.sshfl [vmem:[#allocation1 + $0x8] sm:$0xff pattern:$0x75316420] }
 0x13c   : > { %1000 = vrot.lane.b32.xlu0 %v990_v30, %s1697_s27 }
 0x13d   : > { %1035 = vrot.lane.b32.xlu2 %v1025_v45, %s1697_s27  ;;  %1002 = vrot.lane.b32.xlu1 %v991_v43, %s1697_s27 }
 0x13e   : > { %v698_v47 = vpop.permute.xlu0 %697 }
 0x13f   : > { %v2262_v2 = vpop.permute.xlu2 %798  ;;  %v700_v39 = vpop.permute.xlu1 %699  ;;  %v704_v16 = vsel %vm701_vm4, %v2166_v50, %v698_v47  ;;  %v1058_v50 = vstv %s1566_s28 }
 0x140   : > { %v705_v25 = vsel %vm701_vm4, %v698_v47, %v700_v39  ;;  %v2268_v38 = vadd.f32 %v704_v16, %v2172_v42  ;;  %v1060_v4 = vmul.f32 %v1058_v50, %v1776_v11  ;;  %v1063_v13 = vmul.f32 %v1058_v50, %v1760_v1  ;;  %v2372_v16 = vld.sshfl [vmem:[#allocation1 + $0x18] sm:$0xff pattern:$0x75316420] }
 0x141   : > { %v2273_v18 = vadd.f32 %v705_v25, %v2177_v54  ;;  %v1059_v59 = vmul.f32 %v1058_v50, %v1767_v6 }
 0x144   : > { %1006 = vrot.lane.b32.xlu0 %v993_v52, %s1697_s27 }
 0x145   : > { %1041 = vrot.lane.b32.xlu2 %v1028_v27, %s1697_s27  ;;  %1008 = vrot.lane.b32.xlu1 %v994_v48, %s1697_s27  ;;  %v2380_v48 = vld [vmem:[%s1757_s5] sm:$0xf]  ;;  %s1570_s5 = sld [smem:[#allocation2 + $0xa]] }
 0x146   : > { %v729_v56 = vpop.permute.xlu0 %728 }
 0x147   : > { %v2279_v3 = vpop.permute.xlu2 %829  ;;  %v731_v42 = vpop.permute.xlu1 %730  ;;  %v736_v60 = vsel %vm701_vm4, %v2183_v17, %v729_v56  ;;  %v1027_v17 = vmul.f32 %v1024_v24, %v1769_v7 }
 0x148   : > { %v738_v54 = vsel %vm701_vm4, %v731_v42, %v2205_v63  ;;  %v737_v23 = vsel %vm701_vm4, %v729_v56, %v731_v42  ;;  %v2288_v28 = vadd.f32 %v736_v60, %v2192_v62 }
 0x149   : > { %v2292_v58 = vadd.f32 %v738_v54, %v2196_v40  ;;  %v2295_v10 = vadd.f32 %v737_v23, %v2199_v35 }
 0x14c   : > { %1037 = vrot.lane.b32.xlu0 %v1026_v61, %s1697_s27 }
 0x14d   : > { %1071 = vrot.lane.b32.xlu2 %v1060_v4, %s1697_s27  ;;  %1039 = vrot.lane.b32.xlu1 %v1027_v17, %s1697_s27 }
 0x14e   : > { %v735_v53 = vpop.permute.xlu0 %734 }
 0x14f   : > { %v2301_v62 = vpop.permute.xlu2 %835  ;;  %v761_v5 = vpop.permute.xlu1 %760  ;;  %v739_v11 = vsel %vm701_vm4, %v2205_v63, %v735_v53  ;;  %v1092_v63 = vstv %s1567_s29 }
 0x150   : > { %v770_v40 = vsel %vm701_vm4, %v761_v5, %v2223_v32  ;;  %v2308_v35 = vadd.f32 %v739_v11, %v2212_v26  ;;  %v1095_v34 = vmul.f32 %v2330_v14, %v1092_v63  ;;  %v1094_v30 = vmul.f32 %v2358_v41, %v1092_v63 }
 0x151   : > { %v2313_v55 = vadd.f32 %v770_v40, %v2217_v19  ;;  %v1061_v19 = vmul.f32 %v1058_v50, %v1769_v7  ;;  %v1062_v7 = vmul.f32 %v1058_v50, %v1778_v12  ;;  %v1093_v12 = vmul.f32 %v2348_v57, %v1092_v63 }
 0x152   : > { %v1096_v25 = vmul.f32 %v2372_v16, %v1092_v63  ;;  %v1097_v50 = vmul.f32 %v2380_v48, %v1092_v63 }
 0x154   : > { %1043 = vrot.lane.b32.xlu0 %v1029_v8, %s1697_s27 }
 0x155   : > { %1077 = vrot.lane.b32.xlu2 %v1063_v13, %s1697_s27  ;;  %1069 = vrot.lane.b32.xlu1 %v1059_v59, %s1697_s27 }
 0x156   : > { %v765_v51 = vpop.permute.xlu0 %764 }
 0x157   : > { %v2319_v26 = vpop.permute.xlu2 %865  ;;  %v767_v20 = vpop.permute.xlu1 %766  ;;  %v771_v1 = vsel %vm701_vm4, %v2223_v32, %v765_v51  ;;  %v1127_v32 = vstv %s1568_s30 }
 0x158   : > { %v773_v6 = vsel %vm701_vm4, %v767_v20, %v2245_v31  ;;  %v772_v21 = vsel %vm701_vm4, %v765_v51, %v767_v20  ;;  %v2328_v9 = vadd.f32 %v771_v1, %v2232_v22  ;;  %v1128_v31 = vmul.f32 %v2348_v57, %v1127_v32 }
 0x159   : > { %v2334_v49 = vadd.f32 %v773_v6, %v2236_v15  ;;  %v2337_v44 = vadd.f32 %v772_v21, %v2239_v29  ;;  %v1131_v52 = vmul.f32 %v2372_v16, %v1127_v32  ;;  %v1132_v8 = vmul.f32 %v2380_v48, %v1127_v32 }
 0x15c   : > { %1073 = vrot.lane.b32.xlu0 %v1061_v19, %s1697_s27 }
 0x15d   : > { %1107 = vrot.lane.b32.xlu2 %v1095_v34, %s1698_s4  ;;  %1075 = vrot.lane.b32.xlu1 %v1062_v7, %s1697_s27 }
 0x15e   : > { %v795_v22 = vpop.permute.xlu0 %794 }
 0x15f   : > { %v2343_v0 = vpop.permute.xlu2 %871  ;;  %v797_v24 = vpop.permute.xlu1 %796 }
 0x160   : > { %v806_v15 = vsel %vm804_vm5, %v797_v24, %v2262_v2  ;;  %v805_v29 = vsel %vm804_vm5, %v795_v22, %v797_v24 }
 0x161   : > { %v2353_v33 = vadd.f32 %v806_v15, %v2253_v36  ;;  %v2356_v46 = vadd.f32 %v805_v29, %v2256_v37 }
 0x164   : > { %1103 = vrot.lane.b32.xlu0 %v1093_v12, %s1698_s4 }
 0x165   : > { %1138 = vrot.lane.b32.xlu2 %v1128_v31, %s1698_s4  ;;  %1105 = vrot.lane.b32.xlu1 %v1094_v30, %s1698_s4 }
 0x166   : > { %v801_v45 = vpop.permute.xlu0 %800 }
 0x167   : > { %v2364_v43 = vpop.permute.xlu2 %901  ;;  %v803_v36 = vpop.permute.xlu1 %802  ;;  %v807_v37 = vsel %vm804_vm5, %v2262_v2, %v801_v45  ;;  %v1161_v2 = vstv %s1569_s6 }
 0x168   : > { %v808_v47 = vsel %vm804_vm5, %v801_v45, %v803_v36  ;;  %v2370_v39 = vadd.f32 %v807_v37, %v2268_v38  ;;  %v1163_v4 = vmul.f32 %v2358_v41, %v1161_v2  ;;  %v1166_v13 = vmul.f32 %v2380_v48, %v1161_v2 }
 0x169   : > { %v2377_v27 = vadd.f32 %v808_v47, %v2273_v18  ;;  %v1129_v18 = vmul.f32 %v2358_v41, %v1127_v32  ;;  %v1162_v63 = vmul.f32 %v2348_v57, %v1161_v2  ;;  %v1264_v45 = vstv %s1572_s9 }
 0x16c   : > { %1109 = vrot.lane.b32.xlu0 %v1096_v25, %s1698_s4 }
 0x16d   : > { %1144 = vrot.lane.b32.xlu2 %v1131_v52, %s1698_s4  ;;  %1111 = vrot.lane.b32.xlu1 %v1097_v50, %s1698_s4  ;;  %v1266_v50 = vmul.f32 %v2358_v41, %v1264_v45 }
 0x16e   : > { %v832_v38 = vpop.permute.xlu0 %831 }
 0x16f   : > { %v2386_v56 = vpop.permute.xlu2 %932  ;;  %v834_v42 = vpop.permute.xlu1 %833  ;;  %v839_v60 = vsel %vm804_vm5, %v2279_v3, %v832_v38  ;;  %v1130_v3 = vmul.f32 %v2330_v14, %v1127_v32 }
 0x170   : > { %v841_v61 = vsel %vm804_vm5, %v834_v42, %v2301_v62  ;;  %v840_v54 = vsel %vm804_vm5, %v832_v38, %v834_v42  ;;  %v2395_v23 = vadd.f32 %v839_v60, %v2288_v28 }
 0x171   : > { %v2399_v17 = vadd.f32 %v841_v61, %v2292_v58  ;;  %v2402_v53 = vadd.f32 %v840_v54, %v2295_v10  ;;  %v1269_v54 = vmul.f32 %v2380_v48, %v1264_v45 }
 0x174   : > { %1140 = vrot.lane.b32.xlu0 %v1129_v18, %s1698_s4 }
 0x175   : > { %1174 = vrot.lane.b32.xlu2 %v1163_v4, %s1698_s4  ;;  %1142 = vrot.lane.b32.xlu1 %v1130_v3, %s1698_s4 }
 0x176   : > { %v838_v5 = vpop.permute.xlu0 %837 }
 0x177   : > { %v2408_v28 = vpop.permute.xlu2 %938  ;;  %v864_v11 = vpop.permute.xlu1 %863  ;;  %v842_v58 = vsel %vm804_vm5, %v2301_v62, %v838_v5  ;;  %v2426_v62 = vstv %s1570_s5 }
 0x178   : > { %v873_v10 = vsel %vm804_vm5, %v864_v11, %v2319_v26  ;;  %v2415_v40 = vadd.f32 %v842_v58, %v2308_v35  ;;  %v1199_v34 = vmul.f32 %v2372_v16, %v2426_v62  ;;  %v1197_v15 = vmul.f32 %v2358_v41, %v2426_v62 }
 0x179   : > { %v2420_v59 = vadd.f32 %v873_v10, %v2313_v55  ;;  %v1164_v55 = vmul.f32 %v2330_v14, %v1161_v2  ;;  %v1198_v30 = vmul.f32 %v2330_v14, %v2426_v62  ;;  %v1200_v52 = vmul.f32 %v2380_v48, %v2426_v62 }
 0x17a   : > { %v1267_v10 = vmul.f32 %v2330_v14, %v1264_v45 }
 0x17c   : > { %1146 = vrot.lane.b32.xlu0 %v1132_v8, %s1698_s4 }
 0x17d   : > { %1180 = vrot.lane.b32.xlu2 %v1166_v13, %s1698_s4  ;;  %1172 = vrot.lane.b32.xlu1 %v1162_v63, %s1698_s4  ;;  %v1268_v13 = vmul.f32 %v2372_v16, %v1264_v45 }
 0x17e   : > { %v868_v35 = vpop.permute.xlu0 %867 }
 0x17f   : > { %v2428_v51 = vpop.permute.xlu2 %968  ;;  %v870_v20 = vpop.permute.xlu1 %869  ;;  %v874_v1 = vsel %vm804_vm5, %v2319_v26, %v868_v35  ;;  %v1165_v26 = vmul.f32 %v2372_v16, %v1161_v2 }
 0x180   : > { %v876_v19 = vsel %vm804_vm5, %v870_v20, %v2343_v0  ;;  %v875_v6 = vsel %vm804_vm5, %v868_v35, %v870_v20  ;;  %v2437_v21 = vadd.f32 %v874_v1, %v2328_v9  ;;  %v2451_v9 = vstv %s1571_s7 }
 0x181   : > { %v2442_v7 = vadd.f32 %v876_v19, %v2334_v49  ;;  %v2445_v32 = vadd.f32 %v875_v6, %v2337_v44  ;;  %v1233_v29 = vmul.f32 %v2330_v14, %v2451_v9  ;;  %v1232_v38 = vmul.f32 %v2358_v41, %v2451_v9 }
 0x182   : > { %v1234_v18 = vmul.f32 %v2372_v16, %v2451_v9  ;;  %v1235_v5 = vmul.f32 %v2380_v48, %v2451_v9  ;;  %v1265_v48 = vmul.f32 %v2348_v57, %v1264_v45  ;;  %v1196_v16 = vmul.f32 %v2348_v57, %v2426_v62 }
 0x183   : > { %v1231_v19 = vmul.f32 %v2348_v57, %v2451_v9 }
 0x184   : > { %1176 = vrot.lane.b32.xlu0 %v1164_v55, %s1698_s4 }
 0x185   : > { %1212 = vrot.lane.b32.xlu2 %v1199_v34, %s1699_s8  ;;  %1178 = vrot.lane.b32.xlu1 %v1165_v26, %s1698_s4 }
 0x186   : > { %v898_v22 = vpop.permute.xlu0 %897 }
 0x187   : > { %v975_v0 = vpop.permute.xlu2 %974  ;;  %v900_v49 = vpop.permute.xlu1 %899 }
 0x188   : > { %v909_v44 = vsel %vm907_vm6, %v900_v49, %v2364_v43  ;;  %v908_v24 = vsel %vm907_vm6, %v898_v22, %v900_v49 }
 0x189   : > { %v2461_v12 = vadd.f32 %v909_v44, %v2353_v33  ;;  %v2464_v31 = vadd.f32 %v908_v24, %v2356_v46 }
 0x18c   : > { %1208 = vrot.lane.b32.xlu0 %v1197_v15, %s1699_s8 }
 0x18d   : > { %1245 = vrot.lane.b32.xlu2 %v1233_v29, %s1699_s8  ;;  %1210 = vrot.lane.b32.xlu1 %v1198_v30, %s1699_s8 }
 0x18e   : > { %v904_v36 = vpop.permute.xlu0 %903 }
 0x18f   : > { %v2471_v37 = vpop.permute.xlu2 %1004  ;;  %v906_v47 = vpop.permute.xlu1 %905  ;;  %v910_v33 = vsel %vm907_vm6, %v2364_v43, %v904_v36 }
 0x190   : > { %v911_v46 = vsel %vm907_vm6, %v904_v36, %v906_v47  ;;  %v918_v25 = vadd.f32 %v910_v33, %v2370_v39 }
 0x191   : > { %v919_v2 = vadd.f32 %v911_v46, %v2377_v27 }
 0x194   : > { %1214 = vrot.lane.b32.xlu0 %v1200_v52, %s1699_s8 }
 0x195   : > { %1277 = vrot.lane.b32.xlu2 %v1266_v50, %s1699_s8  ;;  %1243 = vrot.lane.b32.xlu1 %v1232_v38, %s1699_s8 }
 0x196   : > { %v935_v43 = vpop.permute.xlu0 %934 }
 0x197   : > { %v1036_v42 = vpop.permute.xlu2 %1035  ;;  %v937_v60 = vpop.permute.xlu1 %936  ;;  %v942_v39 = vsel %vm907_vm6, %v2386_v56, %v935_v43 }
 0x198   : > { %v944_v27 = vsel %vm907_vm6, %v937_v60, %v2408_v28  ;;  %v943_v41 = vsel %vm907_vm6, %v935_v43, %v937_v60  ;;  %v950_v61 = vadd.f32 %v942_v39, %v2395_v23 }
 0x199   : > { %v952_v4 = vadd.f32 %v944_v27, %v2399_v17  ;;  %v951_v3 = vadd.f32 %v943_v41, %v2402_v53 }
 0x19c   : > { %1247 = vrot.lane.b32.xlu0 %v1234_v18, %s1699_s8 }
 0x19d   : > { %1283 = vrot.lane.b32.xlu2 %v1269_v54, %s1699_s8  ;;  %1249 = vrot.lane.b32.xlu1 %v1235_v5, %s1699_s8 }
 0x19e   : > { %v941_v56 = vpop.permute.xlu0 %940 }
 0x19f   : > { %v1042_v11 = vpop.permute.xlu2 %1041  ;;  %v967_v58 = vpop.permute.xlu1 %966  ;;  %v945_v23 = vsel %vm907_vm6, %v2408_v28, %v941_v56 }
 0x1a0   : > { %v976_v17 = vsel %vm907_vm6, %v967_v58, %v2428_v51  ;;  %v953_v53 = vadd.f32 %v945_v23, %v2415_v40 }
 0x1a1   : > { %v984_v8 = vadd.f32 %v976_v17, %v2420_v59 }
 0x1a4   : > { %1279 = vrot.lane.b32.xlu0 %v1267_v10, %s1699_s8 }
 0x1a5   : > { %1275 = vrot.lane.b32.xlu2 %v1265_v48, %s1699_s8  ;;  %1281 = vrot.lane.b32.xlu1 %v1268_v13, %s1699_s8 }
 0x1a6   : > { %v971_v28 = vpop.permute.xlu0 %970 }
 0x1a7   : > { %v1072_v63 = vpop.permute.xlu2 %1071  ;;  %v973_v35 = vpop.permute.xlu1 %972  ;;  %v977_v40 = vsel %vm907_vm6, %v2428_v51, %v971_v28 }
 0x1a8   : > { %v979_v14 = vsel %vm907_vm6, %v973_v35, %v975_v0  ;;  %v978_v20 = vsel %vm907_vm6, %v971_v28, %v973_v35  ;;  %v985_v59 = vadd.f32 %v977_v40, %v2437_v21 }
 0x1a9   : > { %v987_v1 = vadd.f32 %v979_v14, %v2442_v7  ;;  %v986_v55 = vadd.f32 %v978_v20, %v2445_v32 }
 0x1ac   : > { %1206 = vrot.lane.b32.xlu0 %v1196_v16, %s1699_s8 }
 0x1ad   : > { %1241 = vrot.lane.b32.xlu1 %v1231_v19, %s1699_s8 }
 0x1ae   : > { %v1001_v51 = vpop.permute.xlu0 %1000 }
 0x1af   : > { %v1003_v6 = vpop.permute.xlu1 %1002  ;;  %v1078_v62 = vpop.permute.xlu2 %1077 }
 0x1b0   : > { %v1012_v21 = vsel %vm1010_vm7, %v1003_v6, %v2471_v37  ;;  %v1011_v34 = vsel %vm1010_vm7, %v1001_v51, %v1003_v6 }
 0x1b1   : > { %v1020_v7 = vadd.f32 %v1012_v21, %v2461_v12  ;;  %v1019_v32 = vadd.f32 %v1011_v34, %v2464_v31 }
 0x1b6   : > { %v1007_v26 = vpop.permute.xlu0 %1006 }
 0x1b7   : > { %v1009_v22 = vpop.permute.xlu1 %1008  ;;  %v1013_v57 = vsel %vm1010_vm7, %v2471_v37, %v1007_v26  ;;  %v1108_v44 = vpop.permute.xlu2 %1107 }
 0x1b8   : > { %v1014_v9 = vsel %vm1010_vm7, %v1007_v26, %v1009_v22  ;;  %v1021_v0 = vadd.f32 %v1013_v57, %v918_v25 }
 0x1b9   : > { %v1022_v49 = vadd.f32 %v1014_v9, %v919_v2 }
 0x1be   : > { %v1038_v24 = vpop.permute.xlu0 %1037 }
 0x1bf   : > { %v1040_v15 = vpop.permute.xlu1 %1039  ;;  %v1045_v29 = vsel %vm1010_vm7, %v1036_v42, %v1038_v24  ;;  %v1139_v47 = vpop.permute.xlu2 %1138 }
 0x1c0   : > { %v1047_v30 = vsel %vm1010_vm7, %v1040_v15, %v1042_v11  ;;  %v1046_v12 = vsel %vm1010_vm7, %v1038_v24, %v1040_v15  ;;  %v1053_v45 = vadd.f32 %v1045_v29, %v950_v61 }
 0x1c1   : > { %v2538_v31 = vadd.f32 %v1047_v30, %v952_v4  ;;  %v2540_v36 = vadd.f32 %v1046_v12, %v951_v3 }
 0x1c6   : > { %v1044_v37 = vpop.permute.xlu0 %1043 }
 0x1c7   : > { %v1070_v33 = vpop.permute.xlu1 %1069  ;;  %v1048_v46 = vsel %vm1010_vm7, %v1042_v11, %v1044_v37  ;;  %v1145_v2 = vpop.permute.xlu2 %1144 }
 0x1c8   : > { %v1079_v25 = vsel %vm1010_vm7, %v1070_v33, %v1072_v63  ;;  %v1056_v52 = vadd.f32 %v1048_v46, %v953_v53 }
 0x1c9   : > { %v2544_v50 = vadd.f32 %v1079_v25, %v984_v8 }
 0x1ce   : > { %v1074_v38 = vpop.permute.xlu0 %1073 }
 0x1cf   : > { %v1076_v43 = vpop.permute.xlu1 %1075  ;;  %v1080_v42 = vsel %vm1010_vm7, %v1072_v63, %v1074_v38  ;;  %v1175_v4 = vpop.permute.xlu2 %1174 }
 0x1d0   : > { %v1082_v60 = vsel %vm1010_vm7, %v1076_v43, %v1078_v62  ;;  %v1081_v39 = vsel %vm1010_vm7, %v1074_v38, %v1076_v43  ;;  %v2549_v18 = vadd.f32 %v1080_v42, %v985_v59 }
 0x1d1   : > { %v2551_v27 = vadd.f32 %v1082_v60, %v987_v1  ;;  %v2553_v41 = vadd.f32 %v1081_v39, %v986_v55 }
 0x1d6   : > { %v1104_v61 = vpop.permute.xlu0 %1103 }
 0x1d7   : > { %v1106_v54 = vpop.permute.xlu1 %1105  ;;  %v1181_v10 = vpop.permute.xlu2 %1180 }
 0x1d8   : > { %v1115_v3 = vsel %vm1113_vm8, %v1106_v54, %v1108_v44  ;;  %v1114_v5 = vsel %vm1113_vm8, %v1104_v61, %v1106_v54 }
 0x1d9   : > { %v2557_v56 = vadd.f32 %v1115_v3, %v1020_v7  ;;  %v2559_v11 = vadd.f32 %v1114_v5, %v1019_v32 }
 0x1de   : > { %v1110_v58 = vpop.permute.xlu0 %1109 }
 0x1df   : > { %v1112_v23 = vpop.permute.xlu1 %1111  ;;  %v1116_v17 = vsel %vm1113_vm8, %v1108_v44, %v1110_v58  ;;  %v1213_v63 = vpop.permute.xlu2 %1212 }
 0x1e0   : > { %v1124_v53 = vadd.f32 %v1116_v17, %v1021_v0  ;;  %v1117_v19 = vsel %vm1113_vm8, %v1110_v58, %v1112_v23 }
 0x1e1   : > { %v1125_v6 = vadd.f32 %v1117_v19, %v1022_v49 }
 0x1e6   : > { %v1141_v48 = vpop.permute.xlu0 %1140 }
 0x1e7   : > { %v1143_v8 = vpop.permute.xlu1 %1142  ;;  %v1148_v13 = vsel %vm1113_vm8, %v1139_v47, %v1141_v48  ;;  %v2565_v14 = vpop.permute.xlu2 %1245 }
 0x1e8   : > { %v2563_v28 = vadd.f32 %v1148_v13, %v1053_v45  ;;  %v1150_v9 = vsel %vm1113_vm8, %v1143_v8, %v1145_v2  ;;  %v1149_v37 = vsel %vm1113_vm8, %v1141_v48, %v1143_v8 }
 0x1e9   : > { %v1158_v29 = vadd.f32 %v1150_v9, %v2538_v31  ;;  %v1157_v60 = vadd.f32 %v1149_v37, %v2540_v36 }
 0x1ee   : > { %v1147_v35 = vpop.permute.xlu0 %1146 }
 0x1ef   : > { %v1173_v40 = vpop.permute.xlu1 %1172  ;;  %v1278_v55 = vpop.permute.xlu2 %1277  ;;  %v1151_v0 = vsel %vm1113_vm8, %v1145_v2, %v1147_v35 }
 0x1f0   : > { %v1159_v12 = vadd.f32 %v1151_v0, %v1056_v52  ;;  %v1182_v25 = vsel %vm1113_vm8, %v1173_v40, %v1175_v4 }
 0x1f1   : > { %v1190_v39 = vadd.f32 %v1182_v25, %v2544_v50  ;;  %v1333_v50 = vlaneseq }
 0x1f3   : > { %vm2624_vm4 = vcmp.lt.s32.totalorder %v1333_v50, 512 }
 0x1f6   : > { %v1177_v20 = vpop.permute.xlu0 %1176 }
 0x1f7   : > { %v1179_v59 = vpop.permute.xlu1 %1178  ;;  %v1284_v26 = vpop.permute.xlu2 %1283  ;;  %v1183_v38 = vsel %vm1113_vm8, %v1175_v4, %v1177_v20 }
 0x1f8   : > { %v1185_v2 = vsel %vm1113_vm8, %v1179_v59, %v1181_v10  ;;  %v1184_v31 = vsel %vm1113_vm8, %v1177_v20, %v1179_v59  ;;  %v1191_v54 = vadd.f32 %v1183_v38, %v2549_v18 }
 0x1f9   : > { %v1193_v61 = vadd.f32 %v1185_v2, %v2551_v27  ;;  %v1192_v36 = vadd.f32 %v1184_v31, %v2553_v41 }
 0x1fe   : > { %v2567_v16 = vpop.permute.xlu0 %1208 }
 0x1ff   : > { %v1211_v1 = vpop.permute.xlu1 %1210  ;;  %v1276_v3 = vpop.permute.xlu2 %1275 }
 0x200   : > { %v1219_v51 = vsel %vm1216_vm9, %v1211_v1, %v1213_v63  ;;  %v1218_v18 = vsel %vm1216_vm9, %v2567_v16, %v1211_v1  ;;  %v1285_v17 = vsel %vm1216_vm9, %v1276_v3, %v1278_v55 }
 0x201   : > { %v1227_v21 = vadd.f32 %v1219_v51, %v1124_v53  ;;  %v1293_v40 = vadd.f32 %v1285_v17, %v1190_v39  ;;  %v1226_v1 = vadd.f32 %v1218_v18, %v2557_v56 }
 0x203   : > { %v1302_v22 = vrot.slane %v1227_v21, 6 }
 0x206   : > { %v1215_v34 = vpop.permute.xlu0 %1214 }
 0x207   : > { %v2571_v62 = vpop.permute.xlu1 %1243  ;;  %v1220_v7 = vsel %vm1216_vm9, %v1213_v63, %v1215_v34 }
 0x208   : > { %v1228_v32 = vadd.f32 %v1220_v7, %v1125_v6  ;;  %v1252_v48 = vsel %vm1216_vm9, %v2571_v62, %v2565_v14 }
 0x20a   : > { %v1303_v57 = vrot.slane %v1228_v32, 5 }
 0x20c   : > { %v2577_v49 = vsel %vm1306_vm10, %v1302_v22, %v1303_v57  ;;  %v2580_v44 = vsel %vm1312_vm11, %v1302_v22, %v1303_v57  ;;  %v2583_v24 = vsel %vm1318_vm12, %v1302_v22, %v1303_v57  ;;  %v2586_v15 = vsel %vm1324_vm13, %v1302_v22, %v1303_v57 }
 0x20e   : > { %v1248_v30 = vpop.permute.xlu0 %1247 }
 0x20f   : > { %v1250_v45 = vpop.permute.xlu1 %1249  ;;  %v1253_v47 = vsel %vm1216_vm9, %v2565_v14, %v1248_v30  ;;  %v1260_v14 = vadd.f32 %v1252_v48, %v1157_v60 }
 0x210   : > { %v1254_v33 = vsel %vm1216_vm9, %v1248_v30, %v1250_v45  ;;  %v1261_v46 = vadd.f32 %v1253_v47, %v1158_v29 }
 0x211   : > { %v1262_v43 = vadd.f32 %v1254_v33, %v1159_v12  ;;  %v1301_v33 = vrot.slane %v1226_v1, 7  ;;  %v1348_v2 = vrot.slane %v1260_v14, 7 }
 0x212   : > { %v1349_v42 = vrot.slane %v1261_v46, 6 }
 0x213   : > { %v1350_v52 = vrot.slane %v1262_v43, 5 }
 0x215   : > { %v2602_v5 = vsel %vm1306_vm10, %v1349_v42, %v1350_v52  ;;  %v2605_v4 = vsel %vm1312_vm11, %v1349_v42, %v1350_v52  ;;  %v2608_v58 = vsel %vm1318_vm12, %v1349_v42, %v1350_v52  ;;  %v2611_v23 = vsel %vm1324_vm13, %v1349_v42, %v1350_v52 }
 0x216   : > { %v1280_v27 = vpop.permute.xlu0 %1279 }
 0x217   : > { %v1282_v53 = vpop.permute.xlu1 %1281  ;;  %v1286_v10 = vsel %vm1216_vm9, %v1278_v55, %v1280_v27 }
 0x218   : > { %v1288_v41 = vsel %vm1216_vm9, %v1282_v53, %v1284_v26  ;;  %v1287_v8 = vsel %vm1216_vm9, %v1280_v27, %v1282_v53  ;;  %v1294_v13 = vadd.f32 %v1286_v10, %v1191_v54 }
 0x219   : > { %v1296_v63 = vadd.f32 %v1288_v41, %v1193_v61  ;;  %v1295_v35 = vadd.f32 %v1287_v8, %v1192_v36 }
 0x21a   : > { %v1382_v59 = vrot.slane %v1294_v13, 7 }
 0x21b   : > { %v1384_v55 = vrot.slane %v1296_v63, 5  ;;  %v1383_v19 = vrot.slane %v1295_v35, 6 }
 0x21c   : > { %v1385_v51 = vsel %vm1304_vm14, %v1293_v40, %v1382_v59  ;;  %v1388_v6 = vsel %vm1310_vm0, %v1293_v40, %v1382_v59  ;;  %v1392_v21 = vsel %vm1306_vm10, %v1293_v40, %v1382_v59  ;;  %v1396_v34 = vsel %vm1312_vm11, %v1293_v40, %v1382_v59 }
 0x21d   : > { %v1386_v7 = vsel %vm1306_vm10, %v1383_v19, %v1384_v55  ;;  %v1389_v32 = vsel %vm1312_vm11, %v1383_v19, %v1384_v55  ;;  %v1393_v26 = vsel %vm1318_vm12, %v1383_v19, %v1384_v55  ;;  %v1397_v22 = vsel %vm1324_vm13, %v1383_v19, %v1384_v55 }
 0x21e   : > { %v1387_v56 = vsel %vm1308_vm15, %v1385_v51, %v1386_v7  ;;  %v1390_v57 = vsel %vm1314_vm1, %v1388_v6, %v1389_v32  ;;  %v1394_v9 = vsel %vm1320_vm2, %v1392_v21, %v1393_v26  ;;  %v1398_v0 = vsel %vm1326_vm3, %v1396_v34, %v1397_v22  ;;  %v1207_v29 = vpop.permute.xlu0 %1206 }
 0x21f   : > { %v1391_v30 = vrot.slane %v1390_v57, 1  ;;  %v1395_v12 = vrot.slane %v1394_v9, 2  ;;  %v1399_v45 = vrot.slane %v1398_v0, 3  ;;  %1580 = vst.msk [vmem:[%s2641_s11 + $0x2] ss:$4 sm:$0xf] %vm2624_vm4, %v1387_v56  ;;  %v1242_v47 = vpop.permute.xlu1 %1241  ;;  %v1217_v37 = vsel %vm1216_vm9, %v1207_v29, %v2567_v16 }
 0x220   : > { %v1251_v46 = vsel %vm1216_vm9, %v1242_v47, %v2571_v62  ;;  %v1225_v25 = vadd.f32 %v1217_v37, %v2559_v11 }
 0x221   : > { %1581 = vst.msk [vmem:[%s2641_s11 + $0x12] ss:$4 sm:$0xf] %vm2624_vm4, %v1391_v30  ;;  %v1259_v38 = vadd.f32 %v1251_v46, %v2563_v28 }
 0x222   : > { %1582 = vst.msk [vmem:[%s2641_s11 + $0x22] ss:$4 sm:$0xf] %vm2624_vm4, %v1395_v12  ;;  %v1305_v43 = vsel %vm1304_vm14, %v1225_v25, %v1301_v33  ;;  %v1311_v16 = vsel %vm1310_vm0, %v1225_v25, %v1301_v33  ;;  %v1317_v42 = vsel %vm1306_vm10, %v1225_v25, %v1301_v33  ;;  %v1323_v62 = vsel %vm1312_vm11, %v1225_v25, %v1301_v33 }
 0x223   : > { %1583 = vst.msk [vmem:[%s2641_s11 + $0x32] ss:$4 sm:$0xf] %vm2624_vm4, %v1399_v45  ;;  %v1351_v11 = vsel %vm1304_vm14, %v1259_v38, %v1348_v2  ;;  %v1354_v28 = vsel %vm1310_vm0, %v1259_v38, %v1348_v2  ;;  %v1358_v31 = vsel %vm1306_vm10, %v1259_v38, %v1348_v2  ;;  %v1362_v52 = vsel %vm1312_vm11, %v1259_v38, %v1348_v2 }
 0x224   : > { %v1353_v60 = vsel %vm1308_vm15, %v1351_v11, %v2602_v5  ;;  %v1356_v39 = vsel %vm1314_vm1, %v1354_v28, %v2605_v4  ;;  %v1360_v61 = vsel %vm1320_vm2, %v1358_v31, %v2608_v58  ;;  %v1364_v54 = vsel %vm1326_vm3, %v1362_v52, %v2611_v23 }
 0x225   : > { %v1357_v3 = vrot.slane %v1356_v39, 1  ;;  %v1361_v36 = vrot.slane %v1360_v61, 2  ;;  %v1365_v50 = vrot.slane %v1364_v54, 3  ;;  %1576 = vst.msk [vmem:[%s2641_s11 + $0x1] ss:$4 sm:$0xf] %vm2624_vm4, %v1353_v60  ;;  %v1309_v5 = vsel %vm1308_vm15, %v1305_v43, %v2577_v49 }
 0x226   : > { %v1315_v4 = vsel %vm1314_vm1, %v1311_v16, %v2580_v44  ;;  %v1321_v58 = vsel %vm1320_vm2, %v1317_v42, %v2583_v24  ;;  %v1327_v23 = vsel %vm1326_vm3, %v1323_v62, %v2586_v15  ;;  %1337 = vst.msk [vmem:[%s2641_s11] ss:$4 sm:$0xf] %vm2624_vm4, %v1309_v5 }
 0x227   : > { %1577 = vst.msk [vmem:[%s2641_s11 + $0x11] ss:$4 sm:$0xf] %vm2624_vm4, %v1357_v3  ;;  %v1316_v27 = vrot.slane %v1315_v4, 1  ;;  %v1322_v18 = vrot.slane %v1321_v58, 2  ;;  %v1328_v49 = vrot.slane %v1327_v23, 3 }
 0x228   : > { %1578 = vst.msk [vmem:[%s2641_s11 + $0x21] ss:$4 sm:$0xf] %vm2624_vm4, %v1361_v36  ;;  %1418 = sbr.rel (!%p1745_p4) target bundleno = 568 (0x238), region = 40 }
 0x229   : > { %1579 = vst.msk [vmem:[%s2641_s11 + $0x31] ss:$4 sm:$0xf] %vm2624_vm4, %v1365_v50 }
 0x22a   : > { %1573 = vst.msk [vmem:[%s2641_s11 + $0x10] ss:$4 sm:$0xf] %vm2624_vm4, %v1316_v27 }
 0x22b   : > { %1574 = vst.msk [vmem:[%s2641_s11 + $0x20] ss:$4 sm:$0xf] %vm2624_vm4, %v1322_v18 }
 0x22c   : > { %1575 = vst.msk [vmem:[%s2641_s11 + $0x30] ss:$4 sm:$0xf] %vm2624_vm4, %v1328_v49 }
 0x22d   : > { %v1434_v44 = vld [vmem:[%s2641_s11] sm:$0xff]  ;;  %v1436_v24 = vld [vmem:[%s2641_s11 + $0x8] sm:$0xff] }
 0x22e   : > { %1435 = vst [vmem:[%s1421_s21] sm:$0xff] %v1434_v44 }
 0x22f   : > { %1437 = vst [vmem:[%s1421_s21 + $0x8] sm:$0xff] %v1436_v24 }
 0x231   : > { %v1438_v15 = vld [vmem:[%s2641_s11 + $0x10] sm:$0xff]  ;;  %v1440_v17 = vld [vmem:[%s2641_s11 + $0x18] sm:$0xff] }
 0x232   : > { %v1442_v53 = vld [vmem:[%s2641_s11 + $0x20] sm:$0xff]  ;;  %1439 = vst [vmem:[%s1421_s21 + $0x20] sm:$0xff] %v1438_v15  ;;  %v1444_v10 = vld [vmem:[%s2641_s11 + $0x28] sm:$0xff] }
 0x233   : > { %1441 = vst [vmem:[%s1421_s21 + $0x28] sm:$0xff] %v1440_v17  ;;  %v1446_v48 = vld [vmem:[%s2641_s11 + $0x30] sm:$0xff]  ;;  %v1448_v41 = vld [vmem:[%s2641_s11 + $0x38] sm:$0xff] }
 0x234   : > { %1443 = vst [vmem:[%s1421_s21 + $0x40] sm:$0xff] %v1442_v53 }
 0x235   : > { %1445 = vst [vmem:[%s1421_s21 + $0x48] sm:$0xff] %v1444_v10 }
 0x236   : > { %1447 = vst [vmem:[%s1421_s21 + $0x60] sm:$0xff] %v1446_v48 }
 0x237   : > { %1449 = vst [vmem:[%s1421_s21 + $0x68] sm:$0xff] %v1448_v41 }
 0x238 PF: > { %p11_p12 = scmp.ge.s32.totalorder %s1735_s16, 4   ;;  %s2740_s12 = smov %s1683_s13 }
 0x239   : > { %s2741_s13 = smov %s1743_s19  ;;  %s2742_s14 = smov %s1735_s16 }
 0x23a   :  { %13 = sbr.rel (!%p11_p12) target bundleno = 2 (0x2), region = 105 }
 0x23f   :  { %1465 = vsyncpa [#allocation3], 1 }
 0x240   :  { %1467 = vsyncpa [#allocation3 + $0x1], 1 }

</bundles_post_ra>
